<compile_context>
chip_gen: v5e
topology: v5e:2x2
jax: 0.10.0
libtpu: 0.0.40
codegen_flags: <defaults>
</compile_context>

<pallas_src>
import functools
import math

import jax
import jax.numpy as jnp
import numpy as np
from jax.experimental import pallas as pl
from jax.experimental.pallas import tpu as pltpu

LATENT_DIM = 32
TIMESTEP_EMBED_DIM = 128
HIDDEN_DIM = 256
MAX_RECURSIONS = 4
COMPLEXITY_THRESHOLD = 0.6
LN_EPS = 1e-5


# ----------------------------------------------------------------------------
# parameter init (deterministic, PyTorch-Linear-style uniform(-1/sqrt(fi), ..))
# Large matrices are stored in bf16 (mixed-precision matmuls, f32 accumulate).
# ----------------------------------------------------------------------------
def _linear(key, fan_in, fan_out):
    kw, kb = jax.random.split(key)
    bound = 1.0 / math.sqrt(fan_in)
    w = jax.random.uniform(kw, (fan_in, fan_out), jnp.float32, -bound, bound)
    b = jax.random.uniform(kb, (1, fan_out), jnp.float32, -bound, bound)
    return w, b


def init_params(key, latent_dim=LATENT_DIM, t_dim=TIMESTEP_EMBED_DIM,
                hidden=HIDDEN_DIM, max_rec=MAX_RECURSIONS):
    ks = jax.random.split(key, 9)
    bf16 = jnp.bfloat16
    p = {}
    # timestep_embed: Linear(1, t_dim//2) -> SiLU -> Linear(t_dim//2, t_dim)
    p["Wt1"], p["bt1"] = _linear(ks[0], 1, t_dim // 2)              # f32 (1,64)
    wt2, bt2 = _linear(ks[1], t_dim // 2, t_dim)
    p["Wt2"], p["bt2"] = wt2.astype(bf16), bt2
    # complexity_analyzer
    wc1, bc1 = _linear(ks[2], latent_dim, hidden)
    p["Wc1"], p["bc1"] = wc1.astype(bf16), bc1
    p["gc"] = jnp.ones((1, hidden), jnp.float32)
    p["bec"] = jnp.zeros((1, hidden), jnp.float32)
    wc2, bc2 = _linear(ks[3], hidden, hidden // 2)
    p["Wc2"], p["bc2"] = wc2.astype(bf16), bc2
    p["Wc3"], p["bc3"] = _linear(ks[4], hidden // 2, 1)             # f32 (128,1)
    # router: first Linear over concat([aug, temb, complexity]); the aug/temb
    # part is fused into one bf16 matrix, the complexity column stays f32.
    in_dim = latent_dim + t_dim + 1
    wr1, br1 = _linear(ks[5], in_dim, hidden)
    p["Wr1ab"] = wr1[:latent_dim + t_dim].astype(bf16)              # (160, H)
    p["Wr1c"] = wr1[latent_dim + t_dim:]                            # (1, H) f32
    p["br1"] = br1
    p["gr"] = jnp.ones((1, hidden), jnp.float32)
    p["ber"] = jnp.zeros((1, hidden), jnp.float32)
    wr2, br2 = _linear(ks[6], hidden, hidden // 2)
    p["Wr2"], p["br2"] = wr2.astype(bf16), br2
    p["Wr3"], p["br3"] = _linear(ks[7], hidden // 2, 4)             # f32 (128,4)
    # depth embedding table
    p["depth_embed"] = jax.random.normal(ks[8], (max_rec + 1, latent_dim), jnp.float32)
    return p


# ----------------------------------------------------------------------------
# pack parameters into two slabs (done once; kernel slices them with static,
# tile-aligned offsets).
# ----------------------------------------------------------------------------
def pack_params(p):
    L = p["depth_embed"].shape[1]
    T = p["bt2"].shape[1]
    H = p["bc1"].shape[1]
    H2, T2 = H // 2, T // 2
    assert L % 16 == 0 and T % 16 == 0 and H % 128 == 0
    assert 2 * T <= H and T2 <= H2 and T <= H2 * 2

    KP = ((L + T + 127) // 128) * 128            # router K padded to 128
    rows = L + KP + H + T2                       # 32 + 256 + 256 + 64 = 608
    W16 = jnp.zeros((rows, H), jnp.bfloat16)
    W16 = W16.at[0:L, :].set(p["Wc1"])                               # rows [0,L)
    W16 = W16.at[L:L + (L + T), :].set(p["Wr1ab"])                   # rows [L, L+L+T)
    r2 = L + KP
    W16 = W16.at[r2:r2 + H, 0:H2].set(p["Wc2"])                      # left half
    W16 = W16.at[r2:r2 + H, H2:H].set(p["Wr2"])                      # right half
    r3 = r2 + H
    W16 = W16.at[r3:r3 + T2, 0:T].set(p["Wt2"])                      # rows [r3, r3+T2)

    MISC = jnp.zeros((16, H), jnp.float32)
    rowsets = [
        (0, 0, p["bc1"]), (1, 0, p["gc"]), (2, 0, p["bec"]),
        (3, 0, p["br1"]), (4, 0, p["gr"]), (5, 0, p["ber"]),
        (6, 0, p["Wr1c"]),
        (7, 0, p["bc2"]), (7, H2, p["br2"]),
        (8, 0, p["bt1"]), (8, T, p["bt2"]),
        (9, 0, p["Wt1"]), (9, H2, jnp.transpose(p["Wc3"])),
        (14, 0, p["br3"]),
    ]
    for r, c, v in rowsets:
        v2 = jnp.asarray(v, jnp.float32).reshape(1, -1)
        MISC = MISC.at[r:r + 1, c:c + v2.shape[1]].set(v2)
    MISC = MISC.at[10:14, 0:H2].set(jnp.transpose(p["Wr3"]).astype(jnp.float32))
    MISC = MISC.at[14:15, H2:H2 + 1].set(p["bc3"].reshape(1, 1))

    return {"W16": W16, "MISC": MISC, "depth_embed": p["depth_embed"]}


# ----------------------------------------------------------------------------
# shared math helpers (pure jnp: usable in-kernel and in the reference)
# ----------------------------------------------------------------------------
def _silu(x):
    return x * jax.nn.sigmoid(x)


def _layernorm(x, g, b):
    mu = jnp.mean(x, axis=-1, keepdims=True)
    var = jnp.mean((x - mu) ** 2, axis=-1, keepdims=True)
    return (x - mu) * jax.lax.rsqrt(var + LN_EPS) * g + b


def _mm(x, w):
    # mixed-precision matmul: cast activation to the weight dtype, f32 accum.
    return jnp.dot(x.astype(w.dtype), w, preferred_element_type=jnp.float32)


def _softmax(x):
    m = jnp.max(x, axis=-1, keepdims=True)
    e = jnp.exp(x - m)
    return e / jnp.sum(e, axis=-1, keepdims=True)


# ----------------------------------------------------------------------------
# fused kernel: complexity + timestep embed + router + decision post-processing
# ----------------------------------------------------------------------------
def _fused_kernel(s_ref, x_ref, w16_ref, misc_ref, out_ref,
                  *, B, L, T, H, threshold):
    H2, T2 = H // 2, T // 2
    KP = ((L + T + 127) // 128) * 128
    r_wr1 = L
    r_wc2 = L + KP
    r_wt2 = r_wc2 + H
    bf16 = jnp.bfloat16

    # scalars computed in the wrapper (traced -> no per-step recompiles)
    ts = s_ref[0, 0]        # timestep (f32)
    keep0 = s_ref[0, 1]     # 0.0 if depth >= max_recursions else 1.0
    bonus3 = s_ref[0, 2]    # 0.3 if timestep < 10 else 0.0

    x_all = x_ref[...]                 # (B+1, L): rows [0,B) latent, row B depth-emb
    x = x_all[0:B, :]
    de = x_all[B:B + 1, :]
    x0 = x_all[0:1, :]

    # misc slab views (static, lane offsets are 0 or 128)
    bc1 = misc_ref[0:1, :]
    gc = misc_ref[1:2, :]
    bec = misc_ref[2:3, :]
    br1 = misc_ref[3:4, :]
    gr = misc_ref[4:5, :]
    ber = misc_ref[5:6, :]
    wr1c = misc_ref[6:7, :]
    bc2 = misc_ref[7:8, 0:H2]
    br2 = misc_ref[7:8, H2:H]
    bt1 = misc_ref[8:9, 0:T2]
    bt2 = misc_ref[8:9, T:2 * T]
    wt1 = misc_ref[9:10, 0:T2]
    wc3 = misc_ref[9:10, H2:H]         # Wc3^T as a (1, H2) row
    br3 = misc_ref[14:15, 0:4]
    bc3 = misc_ref[14:15, H2:H2 + 1]

    # ---------------- complexity analysis on latent_state[0] ----------------
    mean = jnp.mean(x0, axis=(0, 1), keepdims=True)                       # (1,1)
    var = jnp.sum((x0 - mean) ** 2, axis=(0, 1), keepdims=True) / (L - 1)  # unbiased
    grad_mag = 2.0 * jnp.sqrt(jnp.sum(x0 * x0, axis=(0, 1), keepdims=True))  # ||2x||

    h = jnp.dot(x0.astype(bf16), w16_ref[0:L, :],
                preferred_element_type=jnp.float32) + bc1                 # (1,H)
    h = _silu(_layernorm(h, gc, bec))
    h = _silu(jnp.dot(h.astype(bf16), w16_ref[r_wc2:r_wc2 + H, 0:H2],
                      preferred_element_type=jnp.float32) + bc2)          # (1,H2)
    # 128 -> 1 head on VPU + XLU (too narrow for the MXU)
    neural = jax.nn.sigmoid(jnp.sum(h * wc3, axis=-1, keepdims=True) + bc3)  # (1,1)

    comp = jnp.minimum(
        0.3 * jnp.minimum(var, 1.0)
        + 0.3 * jnp.minimum(grad_mag / 10.0, 1.0)
        + 0.2 * (ts / 1000.0)
        + 0.2 * neural, 1.0)                                              # (1,1)

    # ---------------- timestep embedding: Linear(1,T/2)->SiLU->Linear -------
    ht = _silu(ts * wt1 + bt1)                                            # (1,T/2)
    temb = jnp.dot(ht.astype(bf16), w16_ref[r_wt2:r_wt2 + T2, 0:T],
                   preferred_element_type=jnp.float32) + bt2              # (1,T)

    # ---------------- augmented state ----------------------------------------
    aug = x + de                                                          # (B,L)

    # ---------------- router MLP (first Linear fused over concat input) -----
    pieces = [aug, jnp.broadcast_to(temb, (B, T))]
    if KP > L + T:
        pieces.append(jnp.zeros((B, KP - L - T), jnp.float32))
    lhs = jnp.concatenate(pieces, axis=1)                                 # (B,KP)
    h1 = (jnp.dot(lhs.astype(bf16), w16_ref[r_wr1:r_wr1 + KP, :],
                  preferred_element_type=jnp.float32)
          + comp * wr1c + br1)                                            # (B,H)
    h1 = _silu(_layernorm(h1, gr, ber))
    # TODO(synk): nn.Dropout(0.1) modeled as eval-mode identity.
    h2 = _silu(jnp.dot(h1.astype(bf16), w16_ref[r_wc2:r_wc2 + H, H2:H],
                       preferred_element_type=jnp.float32) + br2)         # (B,H2)

    # 128 -> 4 head on VPU + XLU (broadcast multiply + cross-lane sums)
    colid = jax.lax.broadcasted_iota(jnp.int32, (B, 4), 1)
    logits = jnp.zeros((B, 4), jnp.float32)
    for j in range(4):
        cj = jnp.sum(h2 * misc_ref[10 + j:11 + j, 0:H2], axis=-1, keepdims=True)
        logits = jnp.where(colid == j, cj, logits)
    logits = logits + br3                                                 # (B,4)
    probs = _softmax(logits)

    # ---------------- decision post-processing ------------------------------
    scale0 = jnp.where(comp < threshold, 0.5, 1.0)                        # (1,1)
    dl = jnp.where(colid == 0, probs * keep0 * scale0, probs)
    dl = jnp.where(colid == 3, dl + bonus3, dl)
    dprobs = _softmax(dl)

    # ---------------- write only the used regions of the output slab --------
    # rows [0:B)   cols [0:4) -> decision_probs   rows [B:2B) cols [0:4) -> logits
    # rows [2B:3B) cols [0:L) -> augmented_state  row 3B cols [0:T) -> temb
    # row 3B+1 col 0 -> complexity   (padding lanes are never read)
    out_ref[0:B, 0:4] = dprobs
    out_ref[B:2 * B, 0:4] = dl
    out_ref[2 * B:3 * B, 0:L] = aug
    out_ref[3 * B:3 * B + 1, 0:T] = temb
    out_ref[3 * B + 1:3 * B + 2, 0:1] = comp


# ----------------------------------------------------------------------------
# wrapper (jit-friendly: timestep / current_depth are traced scalars)
# ----------------------------------------------------------------------------
def diffusion_mor_router_forward(packed, latent_state, timestep, current_depth=0):
    latent_state = jnp.asarray(latent_state, jnp.float32)
    if latent_state.ndim == 1:
        latent_state = latent_state[None, :]
    B, L = latent_state.shape
    T, H = TIMESTEP_EMBED_DIM, HIDDEN_DIM
    assert L >= 2, "unbiased variance divides by (L-1)"
    assert L % 16 == 0 and L <= 128 and T <= 128, "packing assumes these dims"
    assert packed["depth_embed"].shape[1] == L

    ts = jnp.asarray(timestep).astype(jnp.float32)
    depth = jnp.asarray(current_depth).astype(jnp.int32)

    # decision scalars derived outside (scalar selects; stays one compile)
    keep0 = jnp.where(depth >= MAX_RECURSIONS, 0.0, 1.0)
    bonus3 = jnp.where(ts < 10.0, 0.3, 0.0)
    scalars = jnp.stack([ts, keep0, bonus3, jnp.float32(0.0)]
                        ).astype(jnp.float32).reshape(1, 4)

    # clamped depth-embedding gather in the wrapper (no OOB, no dynamic-sublane
    # select on the kernel critical path, one fewer input DMA)
    depth_row = jnp.take(packed["depth_embed"],
                         jnp.clip(depth, 0, MAX_RECURSIONS), axis=0)
    x_in = jnp.concatenate([latent_state, depth_row[None, :]], axis=0)    # (B+1,L)

    rows = 3 * B + 2
    kern = functools.partial(_fused_kernel, B=B, L=L, T=T, H=H,
                             threshold=COMPLEXITY_THRESHOLD)
    smem = pl.BlockSpec(memory_space=pltpu.MemorySpace.SMEM)
    vmem = pl.BlockSpec(memory_space=pltpu.MemorySpace.VMEM)
    slab = pl.pallas_call(
        kern,
        in_specs=[smem, vmem, vmem, vmem],
        out_specs=vmem,
        out_shape=jax.ShapeDtypeStruct((rows, 128), jnp.float32),
    )(scalars, x_in, packed["W16"], packed["MISC"])

    return {
        "routing_probs": slab[0:B, 0:4],
        "decision_logits": slab[B:2 * B, 0:4],
        "augmented_state": slab[2 * B:3 * B, 0:L],
        "timestep_emb": slab[3 * B:3 * B + 1, 0:T],
        "complexity": slab[3 * B + 1, 0],
    }


# ----------------------------------------------------------------------------
# pure-JAX reference (mirrors the PyTorch forward with the same mixed-precision
# parameter choice; eval-mode dropout)
# ----------------------------------------------------------------------------
def reference_forward(params, latent_state, timestep, current_depth=0):
    latent_state = jnp.asarray(latent_state, jnp.float32)
    if latent_state.ndim == 1:
        latent_state = latent_state[None, :]
    B, L = latent_state.shape
    T = params["bt2"].shape[1]
    ts = jnp.asarray(timestep).astype(jnp.float32)
    depth = jnp.asarray(current_depth).astype(jnp.int32)

    x0 = latent_state[0:1]
    var = jnp.sum((x0 - jnp.mean(x0)) ** 2) / (L - 1)
    grad_mag = 2.0 * jnp.sqrt(jnp.sum(x0 * x0))

    h = _mm(x0, params["Wc1"]) + params["bc1"]
    h = _silu(_layernorm(h, params["gc"], params["bec"]))
    h = _silu(_mm(h, params["Wc2"]) + params["bc2"])
    neural = jax.nn.sigmoid(_mm(h, params["Wc3"]) + params["bc3"])[0, 0]
    complexity = jnp.minimum(
        0.3 * jnp.minimum(var, 1.0)
        + 0.3 * jnp.minimum(grad_mag / 10.0, 1.0)
        + 0.2 * (ts / 1000.0)
        + 0.2 * neural, 1.0)

    t2d = ts.reshape(1, 1)
    temb = _mm(_silu(_mm(t2d, params["Wt1"]) + params["bt1"]), params["Wt2"]) + params["bt2"]

    depth_row = jnp.take(params["depth_embed"],
                         jnp.clip(depth, 0, MAX_RECURSIONS), axis=0)[None, :]
    aug = latent_state + depth_row

    lhs = jnp.concatenate([aug, jnp.broadcast_to(temb, (B, T))], axis=1)
    h1 = _mm(lhs, params["Wr1ab"]) + complexity * params["Wr1c"] + params["br1"]
    h1 = _silu(_layernorm(h1, params["gr"], params["ber"]))
    h2 = _silu(_mm(h1, params["Wr2"]) + params["br2"])
    logits = _mm(h2, params["Wr3"]) + params["br3"]
    routing_probs = jax.nn.softmax(logits, axis=-1)

    dl = routing_probs
    dl = dl.at[:, 0].set(jnp.where(depth >= MAX_RECURSIONS, 0.0, dl[:, 0]))
    dl = dl.at[:, 0].multiply(jnp.where(complexity < COMPLEXITY_THRESHOLD, 0.5, 1.0))
    dl = dl.at[:, 3].add(jnp.where(ts < 10.0, 0.3, 0.0))
    dprobs = jax.nn.softmax(dl, axis=-1)
    return {"routing_probs": dprobs, "complexity": complexity, "timestep_emb": temb,
            "decision_logits": dl, "augmented_state": aug}


# ----------------------------------------------------------------------------
if __name__ == "__main__":
    key = jax.random.PRNGKey(0)
    kp, kx = jax.random.split(key)
    params = init_params(kp)
    packed = pack_params(params)

    B = 2
    latent_state = jax.random.normal(kx, (B, LATENT_DIM), jnp.float32)

    # timestep / current_depth are traced -> one compile reused for every step
    fwd = jax.jit(diffusion_mor_router_forward)

    cases = [(5, 1),     # timestep < 10 and depth < max_recursions
             (500, 4)]   # depth >= max_recursions (no recompile for this case)
    for timestep, current_depth in cases:
        out = jax.block_until_ready(fwd(packed, latent_state, timestep, current_depth))
        ref = reference_forward(params, latent_state, timestep, current_depth)

        np.testing.assert_allclose(np.asarray(out["complexity"]),
                                   np.asarray(ref["complexity"]), rtol=1e-3, atol=1e-3)
        np.testing.assert_allclose(np.asarray(out["timestep_emb"]),
                                   np.asarray(ref["timestep_emb"]), rtol=1e-3, atol=1e-3)
        np.testing.assert_allclose(np.asarray(out["augmented_state"]),
                                   np.asarray(ref["augmented_state"]), rtol=1e-3, atol=1e-5)
        np.testing.assert_allclose(np.asarray(out["decision_logits"]),
                                   np.asarray(ref["decision_logits"]), rtol=1e-2, atol=5e-3)
        np.testing.assert_allclose(np.asarray(out["routing_probs"]),
                                   np.asarray(ref["routing_probs"]), rtol=1e-2, atol=5e-3)

    print("KERNEL_OK")
</pallas_src>

<mosaic_0001>
module attributes {stable_mosaic.version = 11 : i64} {
  func.func @_fused_kernel(%arg0: memref<1x4xf32, #tpu.memory_space<smem>>, %arg1: memref<3x32xf32, #tpu.memory_space<vmem>>, %arg2: memref<608x256xbf16, #tpu.memory_space<vmem>>, %arg3: memref<16x256xf32, #tpu.memory_space<vmem>>, %arg4: memref<8x128xf32, #tpu.memory_space<vmem>>) attributes {dimension_semantics = [], scalar_prefetch = 0 : i64, scratch_operands = 0 : i64, tpu.core_type = #tpu.core_type<tc>} {
    %c0 = arith.constant 0 : index
    %c0_0 = arith.constant 0 : index
    %0 = memref.load %arg0[%c0, %c0_0] : memref<1x4xf32, #tpu.memory_space<smem>>
    %c0_1 = arith.constant 0 : index
    %c1 = arith.constant 1 : index
    %1 = memref.load %arg0[%c0_1, %c1] : memref<1x4xf32, #tpu.memory_space<smem>>
    %c0_2 = arith.constant 0 : index
    %c2 = arith.constant 2 : index
    %2 = memref.load %arg0[%c0_2, %c2] : memref<1x4xf32, #tpu.memory_space<smem>>
    %c0_3 = arith.constant 0 : index
    %c0_4 = arith.constant 0 : index
    %3 = vector.load %arg1[%c0_3, %c0_4] : memref<3x32xf32, #tpu.memory_space<vmem>>, vector<3x32xf32>
    %4 = vector.extract_strided_slice %3 {offsets = [0, 0], sizes = [2, 32], strides = [1, 1]} : vector<3x32xf32> to vector<2x32xf32>
    %5 = vector.extract_strided_slice %3 {offsets = [2, 0], sizes = [1, 32], strides = [1, 1]} : vector<3x32xf32> to vector<1x32xf32>
    %6 = vector.extract_strided_slice %3 {offsets = [0, 0], sizes = [1, 32], strides = [1, 1]} : vector<3x32xf32> to vector<1x32xf32>
    %c0_5 = arith.constant 0 : index
    %c0_6 = arith.constant 0 : index
    %7 = vector.load %arg3[%c0_5, %c0_6] : memref<16x256xf32, #tpu.memory_space<vmem>>, vector<1x256xf32>
    %c1_7 = arith.constant 1 : index
    %c0_8 = arith.constant 0 : index
    %8 = vector.load %arg3[%c1_7, %c0_8] : memref<16x256xf32, #tpu.memory_space<vmem>>, vector<1x256xf32>
    %c2_9 = arith.constant 2 : index
    %c0_10 = arith.constant 0 : index
    %9 = vector.load %arg3[%c2_9, %c0_10] : memref<16x256xf32, #tpu.memory_space<vmem>>, vector<1x256xf32>
    %c3 = arith.constant 3 : index
    %c0_11 = arith.constant 0 : index
    %10 = vector.load %arg3[%c3, %c0_11] : memref<16x256xf32, #tpu.memory_space<vmem>>, vector<1x256xf32>
    %c4 = arith.constant 4 : index
    %c0_12 = arith.constant 0 : index
    %11 = vector.load %arg3[%c4, %c0_12] : memref<16x256xf32, #tpu.memory_space<vmem>>, vector<1x256xf32>
    %c5 = arith.constant 5 : index
    %c0_13 = arith.constant 0 : index
    %12 = vector.load %arg3[%c5, %c0_13] : memref<16x256xf32, #tpu.memory_space<vmem>>, vector<1x256xf32>
    %c6 = arith.constant 6 : index
    %c0_14 = arith.constant 0 : index
    %13 = vector.load %arg3[%c6, %c0_14] : memref<16x256xf32, #tpu.memory_space<vmem>>, vector<1x256xf32>
    %c7 = arith.constant 7 : index
    %c0_15 = arith.constant 0 : index
    %14 = vector.load %arg3[%c7, %c0_15] : memref<16x256xf32, #tpu.memory_space<vmem>>, vector<1x128xf32>
    %c7_16 = arith.constant 7 : index
    %c128 = arith.constant 128 : index
    %15 = vector.load %arg3[%c7_16, %c128] : memref<16x256xf32, #tpu.memory_space<vmem>>, vector<1x128xf32>
    %c8 = arith.constant 8 : index
    %c0_17 = arith.constant 0 : index
    %16 = vector.load %arg3[%c8, %c0_17] : memref<16x256xf32, #tpu.memory_space<vmem>>, vector<1x64xf32>
    %c8_18 = arith.constant 8 : index
    %c128_19 = arith.constant 128 : index
    %17 = vector.load %arg3[%c8_18, %c128_19] : memref<16x256xf32, #tpu.memory_space<vmem>>, vector<1x128xf32>
    %c9 = arith.constant 9 : index
    %c0_20 = arith.constant 0 : index
    %18 = vector.load %arg3[%c9, %c0_20] : memref<16x256xf32, #tpu.memory_space<vmem>>, vector<1x64xf32>
    %c9_21 = arith.constant 9 : index
    %c128_22 = arith.constant 128 : index
    %19 = vector.load %arg3[%c9_21, %c128_22] : memref<16x256xf32, #tpu.memory_space<vmem>>, vector<1x128xf32>
    %c14 = arith.constant 14 : index
    %c0_23 = arith.constant 0 : index
    %20 = vector.load %arg3[%c14, %c0_23] : memref<16x256xf32, #tpu.memory_space<vmem>>, vector<1x4xf32>
    %c14_24 = arith.constant 14 : index
    %c128_25 = arith.constant 128 : index
    %21 = vector.load %arg3[%c14_24, %c128_25] : memref<16x256xf32, #tpu.memory_space<vmem>>, vector<1x1xf32>
    %22 = vector.shape_cast %6 : vector<1x32xf32> to vector<1x1x32xf32>
    %cst = arith.constant dense<0.000000e+00> : vector<1xf32>
    %23 = vector.multi_reduction <add>, %22, %cst [1, 2] : vector<1x1x32xf32> to vector<1xf32>
    %24 = vector.shape_cast %23 : vector<1xf32> to vector<1x1x1xf32>
    %25 = vector.extract %24[0, 0, 0] : f32 from vector<1x1x1xf32>
    %26 = vector.broadcast %25 : f32 to vector<1x1xf32>
    %cst_26 = arith.constant 3.200000e+01 : f32
    %27 = vector.broadcast %cst_26 : f32 to vector<1x1xf32>
    %28 = arith.divf %26, %27 : vector<1x1xf32>
    %29 = vector.broadcast %28 : vector<1x1xf32> to vector<1x32xf32>
    %30 = arith.subf %6, %29 : vector<1x32xf32>
    %31 = arith.mulf %30, %30 : vector<1x32xf32>
    %32 = vector.shape_cast %31 : vector<1x32xf32> to vector<1x1x32xf32>
    %cst_27 = arith.constant dense<0.000000e+00> : vector<1xf32>
    %33 = vector.multi_reduction <add>, %32, %cst_27 [1, 2] : vector<1x1x32xf32> to vector<1xf32>
    %34 = vector.shape_cast %33 : vector<1xf32> to vector<1x1x1xf32>
    %35 = vector.extract %34[0, 0, 0] : f32 from vector<1x1x1xf32>
    %36 = vector.broadcast %35 : f32 to vector<1x1xf32>
    %cst_28 = arith.constant 3.100000e+01 : f32
    %37 = vector.broadcast %cst_28 : f32 to vector<1x1xf32>
    %38 = arith.divf %36, %37 : vector<1x1xf32>
    %39 = arith.mulf %6, %6 : vector<1x32xf32>
    %40 = vector.shape_cast %39 : vector<1x32xf32> to vector<1x1x32xf32>
    %cst_29 = arith.constant dense<0.000000e+00> : vector<1xf32>
    %41 = vector.multi_reduction <add>, %40, %cst_29 [1, 2] : vector<1x1x32xf32> to vector<1xf32>
    %42 = vector.shape_cast %41 : vector<1xf32> to vector<1x1x1xf32>
    %43 = vector.extract %42[0, 0, 0] : f32 from vector<1x1x1xf32>
    %44 = vector.broadcast %43 : f32 to vector<1x1xf32>
    %45 = math.sqrt %44 : vector<1x1xf32>
    %cst_30 = arith.constant 2.000000e+00 : f32
    %46 = vector.broadcast %cst_30 : f32 to vector<1x1xf32>
    %47 = arith.mulf %46, %45 : vector<1x1xf32>
    %48 = arith.truncf %6 : vector<1x32xf32> to vector<1x32xbf16>
    %c0_31 = arith.constant 0 : index
    %c0_32 = arith.constant 0 : index
    %49 = vector.load %arg2[%c0_31, %c0_32] : memref<608x256xbf16, #tpu.memory_space<vmem>>, vector<32x256xbf16>
    %cst_33 = arith.constant dense<0.000000e+00> : vector<1x256xf32>
    %50 = tpu.matmul %48, %49, %cst_33 {dimension_numbers = #tpu.dot_dimension_numbers<[1], [0], [0], [1], [0, 0, 1, 1], [], []>} : vector<1x32xbf16>, vector<32x256xbf16>, vector<1x256xf32> -> vector<1x256xf32>
    %51 = arith.addf %50, %7 : vector<1x256xf32>
    %cst_34 = arith.constant dense<0.000000e+00> : vector<1xf32>
    %52 = vector.multi_reduction <add>, %51, %cst_34 [1] : vector<1x256xf32> to vector<1xf32>
    %53 = vector.shape_cast %52 : vector<1xf32> to vector<1x1xf32>
    %cst_35 = arith.constant 2.560000e+02 : f32
    %54 = vector.broadcast %cst_35 : f32 to vector<1x1xf32>
    %55 = arith.divf %53, %54 : vector<1x1xf32>
    %56 = vector.broadcast %55 : vector<1x1xf32> to vector<1x256xf32>
    %57 = arith.subf %51, %56 : vector<1x256xf32>
    %58 = arith.mulf %57, %57 : vector<1x256xf32>
    %cst_36 = arith.constant dense<0.000000e+00> : vector<1xf32>
    %59 = vector.multi_reduction <add>, %58, %cst_36 [1] : vector<1x256xf32> to vector<1xf32>
    %60 = vector.shape_cast %59 : vector<1xf32> to vector<1x1xf32>
    %cst_37 = arith.constant 2.560000e+02 : f32
    %61 = vector.broadcast %cst_37 : f32 to vector<1x1xf32>
    %62 = arith.divf %60, %61 : vector<1x1xf32>
    %63 = vector.broadcast %55 : vector<1x1xf32> to vector<1x256xf32>
    %64 = arith.subf %51, %63 : vector<1x256xf32>
    %cst_38 = arith.constant 9.99999974E-6 : f32
    %65 = vector.broadcast %cst_38 : f32 to vector<1x1xf32>
    %66 = arith.addf %62, %65 : vector<1x1xf32>
    %67 = math.rsqrt %66 : vector<1x1xf32>
    %68 = vector.broadcast %67 : vector<1x1xf32> to vector<1x256xf32>
    %69 = arith.mulf %64, %68 : vector<1x256xf32>
    %70 = arith.mulf %69, %8 : vector<1x256xf32>
    %71 = arith.addf %70, %9 : vector<1x256xf32>
    %72 = arith.negf %71 : vector<1x256xf32>
    %73 = math.exp %72 : vector<1x256xf32>
    %cst_39 = arith.constant 1.000000e+00 : f32
    %74 = vector.broadcast %cst_39 : f32 to vector<1x256xf32>
    %75 = arith.addf %74, %73 : vector<1x256xf32>
    %76 = arith.divf %74, %75 : vector<1x256xf32>
    %77 = arith.mulf %71, %76 : vector<1x256xf32>
    %78 = arith.truncf %77 : vector<1x256xf32> to vector<1x256xbf16>
    %c288 = arith.constant 288 : index
    %c0_40 = arith.constant 0 : index
    %79 = vector.load %arg2[%c288, %c0_40] : memref<608x256xbf16, #tpu.memory_space<vmem>>, vector<256x128xbf16>
    %cst_41 = arith.constant dense<0.000000e+00> : vector<1x128xf32>
    %80 = tpu.matmul %78, %79, %cst_41 {dimension_numbers = #tpu.dot_dimension_numbers<[1], [0], [0], [1], [0, 0, 1, 1], [], []>} : vector<1x256xbf16>, vector<256x128xbf16>, vector<1x128xf32> -> vector<1x128xf32>
    %81 = arith.addf %80, %14 : vector<1x128xf32>
    %82 = arith.negf %81 : vector<1x128xf32>
    %83 = math.exp %82 : vector<1x128xf32>
    %cst_42 = arith.constant 1.000000e+00 : f32
    %84 = vector.broadcast %cst_42 : f32 to vector<1x128xf32>
    %85 = arith.addf %84, %83 : vector<1x128xf32>
    %86 = arith.divf %84, %85 : vector<1x128xf32>
    %87 = arith.mulf %81, %86 : vector<1x128xf32>
    %88 = arith.mulf %87, %19 : vector<1x128xf32>
    %cst_43 = arith.constant dense<0.000000e+00> : vector<1xf32>
    %89 = vector.multi_reduction <add>, %88, %cst_43 [1] : vector<1x128xf32> to vector<1xf32>
    %90 = vector.shape_cast %89 : vector<1xf32> to vector<1x1xf32>
    %91 = arith.addf %90, %21 : vector<1x1xf32>
    %92 = arith.negf %91 : vector<1x1xf32>
    %93 = math.exp %92 : vector<1x1xf32>
    %cst_44 = arith.constant 1.000000e+00 : f32
    %94 = vector.broadcast %cst_44 : f32 to vector<1x1xf32>
    %95 = arith.addf %94, %93 : vector<1x1xf32>
    %96 = arith.divf %94, %95 : vector<1x1xf32>
    %cst_45 = arith.constant 1.000000e+00 : f32
    %97 = vector.broadcast %cst_45 : f32 to vector<1x1xf32>
    %98 = arith.minimumf %38, %97 : vector<1x1xf32>
    %cst_46 = arith.constant 3.000000e-01 : f32
    %99 = vector.broadcast %cst_46 : f32 to vector<1x1xf32>
    %100 = arith.mulf %99, %98 : vector<1x1xf32>
    %cst_47 = arith.constant 1.000000e+01 : f32
    %101 = vector.broadcast %cst_47 : f32 to vector<1x1xf32>
    %102 = arith.divf %47, %101 : vector<1x1xf32>
    %cst_48 = arith.constant 1.000000e+00 : f32
    %103 = vector.broadcast %cst_48 : f32 to vector<1x1xf32>
    %104 = arith.minimumf %102, %103 : vector<1x1xf32>
    %cst_49 = arith.constant 3.000000e-01 : f32
    %105 = vector.broadcast %cst_49 : f32 to vector<1x1xf32>
    %106 = arith.mulf %105, %104 : vector<1x1xf32>
    %107 = arith.addf %100, %106 : vector<1x1xf32>
    %cst_50 = arith.constant 1.000000e+03 : f32
    %108 = arith.divf %0, %cst_50 : f32
    %cst_51 = arith.constant 2.000000e-01 : f32
    %109 = arith.mulf %cst_51, %108 : f32
    %110 = vector.broadcast %109 : f32 to vector<1x1xf32>
    %111 = arith.addf %107, %110 : vector<1x1xf32>
    %cst_52 = arith.constant 2.000000e-01 : f32
    %112 = vector.broadcast %cst_52 : f32 to vector<1x1xf32>
    %113 = arith.mulf %112, %96 : vector<1x1xf32>
    %114 = arith.addf %111, %113 : vector<1x1xf32>
    %cst_53 = arith.constant 1.000000e+00 : f32
    %115 = vector.broadcast %cst_53 : f32 to vector<1x1xf32>
    %116 = arith.minimumf %114, %115 : vector<1x1xf32>
    %117 = vector.broadcast %0 : f32 to vector<1x64xf32>
    %118 = arith.mulf %117, %18 : vector<1x64xf32>
    %119 = arith.addf %118, %16 : vector<1x64xf32>
    %120 = arith.negf %119 : vector<1x64xf32>
    %121 = math.exp %120 : vector<1x64xf32>
    %cst_54 = arith.constant 1.000000e+00 : f32
    %122 = vector.broadcast %cst_54 : f32 to vector<1x64xf32>
    %123 = arith.addf %122, %121 : vector<1x64xf32>
    %124 = arith.divf %122, %123 : vector<1x64xf32>
    %125 = arith.mulf %119, %124 : vector<1x64xf32>
    %126 = arith.truncf %125 : vector<1x64xf32> to vector<1x64xbf16>
    %c544 = arith.constant 544 : index
    %c0_55 = arith.constant 0 : index
    %127 = vector.load %arg2[%c544, %c0_55] : memref<608x256xbf16, #tpu.memory_space<vmem>>, vector<64x128xbf16>
    %cst_56 = arith.constant dense<0.000000e+00> : vector<1x128xf32>
    %128 = tpu.matmul %126, %127, %cst_56 {dimension_numbers = #tpu.dot_dimension_numbers<[1], [0], [0], [1], [0, 0, 1, 1], [], []>} : vector<1x64xbf16>, vector<64x128xbf16>, vector<1x128xf32> -> vector<1x128xf32>
    %129 = arith.addf %128, %17 : vector<1x128xf32>
    %130 = vector.broadcast %5 : vector<1x32xf32> to vector<2x32xf32>
    %131 = arith.addf %4, %130 : vector<2x32xf32>
    %132 = vector.shape_cast %129 : vector<1x128xf32> to vector<1x128xf32>
    %133 = vector.broadcast %132 : vector<1x128xf32> to vector<2x128xf32>
    %cst_57 = arith.constant 0.000000e+00 : f32
    %134 = vector.broadcast %cst_57 : f32 to vector<2x96xf32>
    %135 = tpu.concatenate %131, %133, %134 in 1 : vector<2x32xf32>, vector<2x128xf32>, vector<2x96xf32> -> vector<2x256xf32>
    %136 = arith.truncf %135 : vector<2x256xf32> to vector<2x256xbf16>
    %c32 = arith.constant 32 : index
    %c0_58 = arith.constant 0 : index
    %137 = vector.load %arg2[%c32, %c0_58] : memref<608x256xbf16, #tpu.memory_space<vmem>>, vector<256x256xbf16>
    %cst_59 = arith.constant dense<0.000000e+00> : vector<2x256xf32>
    %138 = tpu.matmul %136, %137, %cst_59 {dimension_numbers = #tpu.dot_dimension_numbers<[1], [0], [0], [1], [0, 0, 1, 1], [], []>} : vector<2x256xbf16>, vector<256x256xbf16>, vector<2x256xf32> -> vector<2x256xf32>
    %139 = vector.broadcast %116 : vector<1x1xf32> to vector<1x256xf32>
    %140 = arith.mulf %139, %13 : vector<1x256xf32>
    %141 = vector.broadcast %140 : vector<1x256xf32> to vector<2x256xf32>
    %142 = arith.addf %138, %141 : vector<2x256xf32>
    %143 = vector.broadcast %10 : vector<1x256xf32> to vector<2x256xf32>
    %144 = arith.addf %142, %143 : vector<2x256xf32>
    %cst_60 = arith.constant dense<0.000000e+00> : vector<2xf32>
    %145 = vector.multi_reduction <add>, %144, %cst_60 [1] : vector<2x256xf32> to vector<2xf32>
    %146 = vector.shape_cast %145 : vector<2xf32> to vector<2x1xf32>
    %cst_61 = arith.constant 2.560000e+02 : f32
    %147 = vector.broadcast %cst_61 : f32 to vector<2x1xf32>
    %148 = arith.divf %146, %147 : vector<2x1xf32>
    %149 = vector.broadcast %148 : vector<2x1xf32> to vector<2x256xf32>
    %150 = arith.subf %144, %149 : vector<2x256xf32>
    %151 = arith.mulf %150, %150 : vector<2x256xf32>
    %cst_62 = arith.constant dense<0.000000e+00> : vector<2xf32>
    %152 = vector.multi_reduction <add>, %151, %cst_62 [1] : vector<2x256xf32> to vector<2xf32>
    %153 = vector.shape_cast %152 : vector<2xf32> to vector<2x1xf32>
    %cst_63 = arith.constant 2.560000e+02 : f32
    %154 = vector.broadcast %cst_63 : f32 to vector<2x1xf32>
    %155 = arith.divf %153, %154 : vector<2x1xf32>
    %156 = vector.broadcast %148 : vector<2x1xf32> to vector<2x256xf32>
    %157 = arith.subf %144, %156 : vector<2x256xf32>
    %cst_64 = arith.constant 9.99999974E-6 : f32
    %158 = vector.broadcast %cst_64 : f32 to vector<2x1xf32>
    %159 = arith.addf %155, %158 : vector<2x1xf32>
    %160 = math.rsqrt %159 : vector<2x1xf32>
    %161 = vector.broadcast %160 : vector<2x1xf32> to vector<2x256xf32>
    %162 = arith.mulf %157, %161 : vector<2x256xf32>
    %163 = vector.broadcast %11 : vector<1x256xf32> to vector<2x256xf32>
    %164 = arith.mulf %162, %163 : vector<2x256xf32>
    %165 = vector.broadcast %12 : vector<1x256xf32> to vector<2x256xf32>
    %166 = arith.addf %164, %165 : vector<2x256xf32>
    %167 = arith.negf %166 : vector<2x256xf32>
    %168 = math.exp %167 : vector<2x256xf32>
    %cst_65 = arith.constant 1.000000e+00 : f32
    %169 = vector.broadcast %cst_65 : f32 to vector<2x256xf32>
    %170 = arith.addf %169, %168 : vector<2x256xf32>
    %171 = arith.divf %169, %170 : vector<2x256xf32>
    %172 = arith.mulf %166, %171 : vector<2x256xf32>
    %173 = arith.truncf %172 : vector<2x256xf32> to vector<2x256xbf16>
    %c288_66 = arith.constant 288 : index
    %c128_67 = arith.constant 128 : index
    %174 = vector.load %arg2[%c288_66, %c128_67] : memref<608x256xbf16, #tpu.memory_space<vmem>>, vector<256x128xbf16>
    %cst_68 = arith.constant dense<0.000000e+00> : vector<2x128xf32>
    %175 = tpu.matmul %173, %174, %cst_68 {dimension_numbers = #tpu.dot_dimension_numbers<[1], [0], [0], [1], [0, 0, 1, 1], [], []>} : vector<2x256xbf16>, vector<256x128xbf16>, vector<2x128xf32> -> vector<2x128xf32>
    %176 = vector.broadcast %15 : vector<1x128xf32> to vector<2x128xf32>
    %177 = arith.addf %175, %176 : vector<2x128xf32>
    %178 = arith.negf %177 : vector<2x128xf32>
    %179 = math.exp %178 : vector<2x128xf32>
    %cst_69 = arith.constant 1.000000e+00 : f32
    %180 = vector.broadcast %cst_69 : f32 to vector<2x128xf32>
    %181 = arith.addf %180, %179 : vector<2x128xf32>
    %182 = arith.divf %180, %181 : vector<2x128xf32>
    %183 = arith.mulf %177, %182 : vector<2x128xf32>
    %184 = tpu.iota {dimensions = array<i32: 1>} : vector<2x4xi32>
    %cst_70 = arith.constant 0.000000e+00 : f32
    %185 = vector.broadcast %cst_70 : f32 to vector<2x4xf32>
    %c10 = arith.constant 10 : index
    %c0_71 = arith.constant 0 : index
    %186 = vector.load %arg3[%c10, %c0_71] : memref<16x256xf32, #tpu.memory_space<vmem>>, vector<1x128xf32>
    %187 = vector.broadcast %186 : vector<1x128xf32> to vector<2x128xf32>
    %188 = arith.mulf %183, %187 : vector<2x128xf32>
    %cst_72 = arith.constant dense<0.000000e+00> : vector<2xf32>
    %189 = vector.multi_reduction <add>, %188, %cst_72 [1] : vector<2x128xf32> to vector<2xf32>
    %190 = vector.shape_cast %189 : vector<2xf32> to vector<2x1xf32>
    %c0_i32 = arith.constant 0 : i32
    %191 = vector.broadcast %c0_i32 : i32 to vector<2x4xi32>
    %192 = arith.cmpi eq, %184, %191 : vector<2x4xi32>
    %193 = vector.shape_cast %190 : vector<2x1xf32> to vector<2x1xf32>
    %194 = vector.broadcast %193 : vector<2x1xf32> to vector<2x4xf32>
    %195 = arith.select %192, %194, %185 : vector<2x4xi1>, vector<2x4xf32>
    %c11 = arith.constant 11 : index
    %c0_73 = arith.constant 0 : index
    %196 = vector.load %arg3[%c11, %c0_73] : memref<16x256xf32, #tpu.memory_space<vmem>>, vector<1x128xf32>
    %197 = vector.broadcast %196 : vector<1x128xf32> to vector<2x128xf32>
    %198 = arith.mulf %183, %197 : vector<2x128xf32>
    %cst_74 = arith.constant dense<0.000000e+00> : vector<2xf32>
    %199 = vector.multi_reduction <add>, %198, %cst_74 [1] : vector<2x128xf32> to vector<2xf32>
    %200 = vector.shape_cast %199 : vector<2xf32> to vector<2x1xf32>
    %c1_i32 = arith.constant 1 : i32
    %201 = vector.broadcast %c1_i32 : i32 to vector<2x4xi32>
    %202 = arith.cmpi eq, %184, %201 : vector<2x4xi32>
    %203 = vector.shape_cast %200 : vector<2x1xf32> to vector<2x1xf32>
    %204 = vector.broadcast %203 : vector<2x1xf32> to vector<2x4xf32>
    %205 = arith.select %202, %204, %195 : vector<2x4xi1>, vector<2x4xf32>
    %c12 = arith.constant 12 : index
    %c0_75 = arith.constant 0 : index
    %206 = vector.load %arg3[%c12, %c0_75] : memref<16x256xf32, #tpu.memory_space<vmem>>, vector<1x128xf32>
    %207 = vector.broadcast %206 : vector<1x128xf32> to vector<2x128xf32>
    %208 = arith.mulf %183, %207 : vector<2x128xf32>
    %cst_76 = arith.constant dense<0.000000e+00> : vector<2xf32>
    %209 = vector.multi_reduction <add>, %208, %cst_76 [1] : vector<2x128xf32> to vector<2xf32>
    %210 = vector.shape_cast %209 : vector<2xf32> to vector<2x1xf32>
    %c2_i32 = arith.constant 2 : i32
    %211 = vector.broadcast %c2_i32 : i32 to vector<2x4xi32>
    %212 = arith.cmpi eq, %184, %211 : vector<2x4xi32>
    %213 = vector.shape_cast %210 : vector<2x1xf32> to vector<2x1xf32>
    %214 = vector.broadcast %213 : vector<2x1xf32> to vector<2x4xf32>
    %215 = arith.select %212, %214, %205 : vector<2x4xi1>, vector<2x4xf32>
    %c13 = arith.constant 13 : index
    %c0_77 = arith.constant 0 : index
    %216 = vector.load %arg3[%c13, %c0_77] : memref<16x256xf32, #tpu.memory_space<vmem>>, vector<1x128xf32>
    %217 = vector.broadcast %216 : vector<1x128xf32> to vector<2x128xf32>
    %218 = arith.mulf %183, %217 : vector<2x128xf32>
    %cst_78 = arith.constant dense<0.000000e+00> : vector<2xf32>
    %219 = vector.multi_reduction <add>, %218, %cst_78 [1] : vector<2x128xf32> to vector<2xf32>
    %220 = vector.shape_cast %219 : vector<2xf32> to vector<2x1xf32>
    %c3_i32 = arith.constant 3 : i32
    %221 = vector.broadcast %c3_i32 : i32 to vector<2x4xi32>
    %222 = arith.cmpi eq, %184, %221 : vector<2x4xi32>
    %223 = vector.shape_cast %220 : vector<2x1xf32> to vector<2x1xf32>
    %224 = vector.broadcast %223 : vector<2x1xf32> to vector<2x4xf32>
    %225 = arith.select %222, %224, %215 : vector<2x4xi1>, vector<2x4xf32>
    %226 = vector.broadcast %20 : vector<1x4xf32> to vector<2x4xf32>
    %227 = arith.addf %225, %226 : vector<2x4xf32>
    %cst_79 = arith.constant dense<0xFF800000> : vector<2xf32>
    %228 = vector.multi_reduction <maximumf>, %227, %cst_79 [1] : vector<2x4xf32> to vector<2xf32>
    %229 = vector.shape_cast %228 : vector<2xf32> to vector<2x1xf32>
    %230 = vector.broadcast %229 : vector<2x1xf32> to vector<2x4xf32>
    %231 = arith.subf %227, %230 : vector<2x4xf32>
    %232 = math.exp %231 : vector<2x4xf32>
    %cst_80 = arith.constant dense<0.000000e+00> : vector<2xf32>
    %233 = vector.multi_reduction <add>, %232, %cst_80 [1] : vector<2x4xf32> to vector<2xf32>
    %234 = vector.shape_cast %233 : vector<2xf32> to vector<2x1xf32>
    %235 = vector.broadcast %234 : vector<2x1xf32> to vector<2x4xf32>
    %236 = arith.divf %232, %235 : vector<2x4xf32>
    %cst_81 = arith.constant 6.000000e-01 : f32
    %237 = vector.broadcast %cst_81 : f32 to vector<1x1xf32>
    %238 = arith.cmpf olt, %116, %237 : vector<1x1xf32>
    %cst_82 = arith.constant 5.000000e-01 : f32
    %cst_83 = arith.constant 1.000000e+00 : f32
    %239 = vector.broadcast %cst_82 : f32 to vector<1x1xf32>
    %240 = vector.broadcast %cst_83 : f32 to vector<1x1xf32>
    %241 = arith.select %238, %239, %240 : vector<1x1xi1>, vector<1x1xf32>
    %c0_i32_84 = arith.constant 0 : i32
    %242 = vector.broadcast %c0_i32_84 : i32 to vector<2x4xi32>
    %243 = arith.cmpi eq, %184, %242 : vector<2x4xi32>
    %244 = vector.broadcast %1 : f32 to vector<2x4xf32>
    %245 = arith.mulf %236, %244 : vector<2x4xf32>
    %246 = vector.broadcast %241 : vector<1x1xf32> to vector<2x4xf32>
    %247 = arith.mulf %245, %246 : vector<2x4xf32>
    %248 = arith.select %243, %247, %236 : vector<2x4xi1>, vector<2x4xf32>
    %c3_i32_85 = arith.constant 3 : i32
    %249 = vector.broadcast %c3_i32_85 : i32 to vector<2x4xi32>
    %250 = arith.cmpi eq, %184, %249 : vector<2x4xi32>
    %251 = vector.broadcast %2 : f32 to vector<2x4xf32>
    %252 = arith.addf %248, %251 : vector<2x4xf32>
    %253 = arith.select %250, %252, %248 : vector<2x4xi1>, vector<2x4xf32>
    %cst_86 = arith.constant dense<0xFF800000> : vector<2xf32>
    %254 = vector.multi_reduction <maximumf>, %253, %cst_86 [1] : vector<2x4xf32> to vector<2xf32>
    %255 = vector.shape_cast %254 : vector<2xf32> to vector<2x1xf32>
    %256 = vector.broadcast %255 : vector<2x1xf32> to vector<2x4xf32>
    %257 = arith.subf %253, %256 : vector<2x4xf32>
    %258 = math.exp %257 : vector<2x4xf32>
    %cst_87 = arith.constant dense<0.000000e+00> : vector<2xf32>
    %259 = vector.multi_reduction <add>, %258, %cst_87 [1] : vector<2x4xf32> to vector<2xf32>
    %260 = vector.shape_cast %259 : vector<2xf32> to vector<2x1xf32>
    %261 = vector.broadcast %260 : vector<2x1xf32> to vector<2x4xf32>
    %262 = arith.divf %258, %261 : vector<2x4xf32>
    %c0_88 = arith.constant 0 : index
    %c0_89 = arith.constant 0 : index
    %263 = vector.load %arg4[%c0_88, %c0_89] : memref<8x128xf32, #tpu.memory_space<vmem>>, vector<2x4xf32>
    tpu.vector_store %arg4[%c0_88, %c0_89], %262 {strides = array<i32>} : memref<8x128xf32, #tpu.memory_space<vmem>>, vector<2x4xf32>,
    %c2_90 = arith.constant 2 : index
    %c0_91 = arith.constant 0 : index
    %264 = vector.load %arg4[%c2_90, %c0_91] : memref<8x128xf32, #tpu.memory_space<vmem>>, vector<2x4xf32>
    tpu.vector_store %arg4[%c2_90, %c0_91], %253 {strides = array<i32>} : memref<8x128xf32, #tpu.memory_space<vmem>>, vector<2x4xf32>,
    %c4_92 = arith.constant 4 : index
    %c0_93 = arith.constant 0 : index
    %265 = vector.load %arg4[%c4_92, %c0_93] : memref<8x128xf32, #tpu.memory_space<vmem>>, vector<2x32xf32>
    tpu.vector_store %arg4[%c4_92, %c0_93], %131 {strides = array<i32>} : memref<8x128xf32, #tpu.memory_space<vmem>>, vector<2x32xf32>,
    %c6_94 = arith.constant 6 : index
    %c0_95 = arith.constant 0 : index
    %266 = vector.load %arg4[%c6_94, %c0_95] : memref<8x128xf32, #tpu.memory_space<vmem>>, vector<1x128xf32>
    tpu.vector_store %arg4[%c6_94, %c0_95], %129 {strides = array<i32>} : memref<8x128xf32, #tpu.memory_space<vmem>>, vector<1x128xf32>,
    %c7_96 = arith.constant 7 : index
    %c0_97 = arith.constant 0 : index
    %267 = vector.load %arg4[%c7_96, %c0_97] : memref<8x128xf32, #tpu.memory_space<vmem>>, vector<1x1xf32>
    tpu.vector_store %arg4[%c7_96, %c0_97], %116 {strides = array<i32>} : memref<8x128xf32, #tpu.memory_space<vmem>>, vector<1x1xf32>,
    return
  }
}

</mosaic_0001>

<bundles_post_ra>
// kernel: diffusion_mor_router_forward.1
= control target key start
LH: loop header
LB: loop body
LE: loop exit
PB: predicated region body
PF: predicated region fallthrough
CT: control target
= control target key end

     0   :  { %9 = vsyncpa [#allocation4], 0  ;;  %s1938_s0 = inlined_call_operand.vmem [shape: f32[1,4], index: 0, kind: input, shape index: {}]   ;;  %s1939_s1 = inlined_call_operand.vmem [shape: f32[3,32], index: 1, kind: input, shape index: {}]   ;;  %s1940_s2 = inlined_call_operand.hbm [shape: bf16[608,256], index: 2, kind: input, shape index: {}]   ;;  %s1941_s3 = inlined_call_operand.vmem [shape: f32[16,256], index: 3, kind: input, shape index: {}]   ;;  %s1942_s4 = inlined_call_operand.vmem [shape: f32[8,128], index: 4, kind: output, shape index: {}]  }
   0x1   :  { %s16_s17 = sshll.u32 %s1938_s0, 4  ;;  %s17_s17 = int_to_ptr.vmem [resolvable:$true] %s16_s17 }
   0x2   :  { %10 = vsyncpa [#allocation3], 0  ;;  %s26_s20 = sshll.u32 %s1940_s2, 4  ;;  %s1737_s21 = smov [#allocation2]   ;;  %s27_s20 = int_to_ptr.hbm [resolvable:$true] %s26_s20 }
   0x3   :  { %19 = dma.vmem_to_smem %s17_s17, 16, %s1737_s21, [#allocation4]  }
   0x4   :  { %s1738_s22 = smov [#allocation5]   ;;  %s1739_s24 = smov 128  }
   0x5   :  { %s28_s23 = sshll.u32 %s1738_s22, 4  ;;  %s1740_s25 = smov 8   ;;  %s29_s23 = int_to_ptr.vmem [resolvable:$true] %s28_s23 }
   0x6   :  { %34 = dma.hbm_to_vmem [thread:$0]  %s27_s20, 9728, %s29_s23, [#allocation3], %s1739_s24, %s1739_s24, %s1740_s25  }
   0x7   :  { %1733 = dma.done.wait [#allocation4], 16  }
   0x8   :  { %1734 = vsyncadd [#allocation4], 4294967280 }
   0x9   :  { %1735 = dma.done.wait [#allocation3], 9728  }
   0xa   :  { %1736 = vsyncadd [#allocation3], 4294957568 }
   0xb   :  { %45 = sfence }
   0xc   :  { %v1250_v0 = vld [vmem:[#allocation5 + $0x10] sm:$0xf]  ;;  %v1548_v1 = vld [vmem:[#allocation5 + $0x14] sm:$0xf0]  ;;  %v1547_v2 = vld [vmem:[#allocation5 + $0x14] sm:$0xf] }
   0xd   :  { %v1251_v3 = vor.u32 %v1548_v1, %v1250_v0  ;;  %v1252_v4 = vld [vmem:[#allocation5 + $0x18] sm:$0xf0]  ;;  %v1242_v5 = vld [vmem:[#allocation5] sm:$0xf]  ;;  %v1546_v6 = vld [vmem:[#allocation5 + $0x4] sm:$0xf0] }
   0xe   :  { %v1255_v7 = vor.u32 %v1547_v2, %v1252_v4  ;;  %v1545_v8 = vld [vmem:[#allocation5 + $0x4] sm:$0xf]  ;;  %v1244_v9 = vld [vmem:[#allocation5 + $0x8] sm:$0xf0]  ;;  %v1243_v10 = vor.u32 %v1546_v6, %v1242_v5  ;;  %v1783_v11 = vld [vmem:[%s1939_s1] sm:$0x7] }
   0xf   :  { %178 = vmatpush.bf16.msra.mxu2 %v1251_v3  ;;  %v1247_v12 = vor.u32 %v1545_v8, %v1244_v9  ;;  %v138_v13 = vpack.c.bf16 %v1783_v11, %v1783_v11  ;;  %vm168_vm0 = vcmask 261120   ;;  %v51_v14 = vld [vmem:[%s1941_s3] ss:$8 sm:$0x3]  ;;  %vm198_vm1 = vcmask 1040384   ;;  %s1818_s5 = sld [smem:[#allocation2]] }
  0x10   :  { %191 = vmatpush.bf16.msra.mxu1 %v1255_v7  ;;  %v165_v15 = vperm.slane %v51_v14, 1  ;;  %v164_v18 = vperm.slane %v51_v14, 0  ;;  %v1741_v26 = vmov 256.0   ;;  %vm72_vm2 = vcmask 253952   ;;  %v1290_v43 = vld [vmem:[#allocation5 + $0x190] sm:$0xf] }
  0x11   :  { %1641 = vrcp.f32 %v1741_v26  ;;  %v73_v28 = vsel %vm72_vm2, %v1783_v11, 0.0  ;;  %v1556_v44 = vld [vmem:[#allocation5 + $0x194] sm:$0xf0]  ;;  %v1322_v45 = vld [vmem:[#allocation5 + $0x210] sm:$0xf]  ;;  %s1744_s19 = smov 32  }
  0x12   :  { %74 = vadd.xlane.f32.xlu1 %v73_v28  ;;  %v1291_v46 = vor.u32 %v1556_v44, %v1290_v43  ;;  %v1564_v47 = vld [vmem:[#allocation5 + $0x214] sm:$0xf0]  ;;  %v1286_v48 = vld [vmem:[#allocation5 + $0x180] sm:$0xf]  ;;  %v1555_v49 = vld [vmem:[#allocation5 + $0x184] sm:$0xf0] }
  0x13   :  { %179 = vmatpush.bf16.msra.mxu2 %v1243_v10  ;;  %v1323_v50 = vor.u32 %v1564_v47, %v1322_v45  ;;  %v1318_v51 = vld [vmem:[#allocation5 + $0x200] sm:$0xf]  ;;  %v1563_v52 = vld [vmem:[#allocation5 + $0x204] sm:$0xf0]  ;;  %v1287_v53 = vor.u32 %v1555_v49, %v1286_v48  ;;  %v1282_v55 = vld [vmem:[#allocation5 + $0x170] sm:$0xf] }
  0x14   :  { %192 = vmatpush.bf16.msra.mxu1 %v1247_v12  ;;  %v1319_v54 = vor.u32 %v1563_v52, %v1318_v51  ;;  %v1554_v56 = vld [vmem:[#allocation5 + $0x174] sm:$0xf0]  ;;  %v1314_v57 = vld [vmem:[#allocation5 + $0x1f0] sm:$0xf]  ;;  %v1278_v61 = vld [vmem:[#allocation5 + $0x160] sm:$0xf] }
  0x15   :  { %432 = vmatpush.bf16.msra.mxu3 %v1323_v50  ;;  %v1562_v58 = vld [vmem:[#allocation5 + $0x1f4] sm:$0xf0]  ;;  %v1283_v59 = vor.u32 %v1554_v56, %v1282_v55  ;;  %v1553_v62 = vld [vmem:[#allocation5 + $0x164] sm:$0xf0]  ;;  %v1310_v0 = vld [vmem:[#allocation5 + $0x1e0] sm:$0xf] }
  0x16   :  { %1256 = vmatmul.msk.bf16.vlgmr.msra.gmra.mxu2 %vm168_vm0, %v138_v13  ;;  %v1315_v60 = vor.u32 %v1562_v58, %v1314_v57  ;;  %v1561_v1 = vld [vmem:[#allocation5 + $0x1e4] sm:$0xf0]  ;;  %v1279_v3 = vor.u32 %v1553_v62, %v1278_v61  ;;  %v1274_v6 = vld [vmem:[#allocation5 + $0x150] sm:$0xf]  ;;  %v1552_v7 = vld [vmem:[#allocation5 + $0x154] sm:$0xf0] }
  0x17   :  { %1257 = vmatmul.msk.bf16.vlgmr.msra.gmra.mxu1 %vm168_vm0, %v138_v13  ;;  %v1642_v27 = vpop.eup %1641  ;;  %419 = vmatpush.bf16.msrb.mxu2 %v1291_v46  ;;  %v1311_v5 = vor.u32 %v1561_v1, %v1310_v0  ;;  %v1306_v8 = vld [vmem:[#allocation5 + $0x1d0] sm:$0xf]  ;;  %v1560_v9 = vld [vmem:[#allocation5 + $0x1d4] sm:$0xf0]  ;;  %v1275_v10 = vor.u32 %v1552_v7, %v1274_v6  ;;  %v1270_v13 = vld [vmem:[#allocation5 + $0x140] sm:$0xf] }
  0x18   :  { %v205_v29 = vmul.f32 256.0, %v1642_v27  ;;  %vm209_vm3 = vweird.f32 %v1642_v27  ;;  %v1307_v12 = vor.u32 %v1560_v9, %v1306_v8  ;;  %v1551_v14 = vld [vmem:[#allocation5 + $0x144] sm:$0xf0]  ;;  %v1262_v28 = vld [vmem:[#allocation5 + $0x120] sm:$0xf]  ;;  %s1233_s22 = sld [smem:[#allocation2 + $0x2]] }
  0x19   :  { %433 = vmatpush.bf16.msra.mxu3 %v1319_v54  ;;  %v1235_v43 = vld [vmem:[%s1941_s3 + $0x2] ss:$8 sm:$0x3] }
  0x1a   :  { %v206_v30 = vsub.f32 1.0, %v205_v29  ;;  %v1549_v29 = vld [vmem:[#allocation5 + $0x124] sm:$0xf0]  ;;  %v243_v49 = vperm.slane %v1235_v43, 0  ;;  %v244_v51 = vperm.slane %v1235_v43, 1 }
  0x1b   :  { %420 = vmatpush.bf16.msrb.mxu2 %v1287_v53  ;;  %v66_v43 = vld [vmem:[%s1941_s3 + $0x10] ss:$0 sm:$0xff] }
  0x1c   :  { %v207_v31 = vmul.f32 %v1642_v27, %v206_v30 }
  0x1d   :  { %434 = vmatpush.bf16.msra.mxu3 %v1315_v60 }
  0x1e   :  { %v208_v32 = vadd.f32 %v1642_v27, %v207_v31 }
  0x1f   :  { %421 = vmatpush.bf16.msrb.mxu2 %v1283_v59 }
  0x20   :  { %v1796_v33 = vsel %vm209_vm3, %v1642_v27, %v208_v32  ;;  %v1294_v32 = vld [vmem:[#allocation5 + $0x1a0] sm:$0xf] }
  0x21   :  { %435 = vmatpush.bf16.msra.mxu3 %v1311_v5 }
  0x23   :  { %422 = vmatpush.bf16.msrb.mxu2 %v1279_v3 }
  0x25   :  { %436 = vmatpush.bf16.msra.mxu3 %v1307_v12 }
  0x27   :  { %423 = vmatpush.bf16.msrb.mxu2 %v1275_v10 }
  0x85   :  { %v75_v30 = vpop.xlane.xlu1 %74 }
  0x94   :  { %v194_v16 = vpop.f32.mrf.mxu1 }
  0x95   :  { %v195_v17 = vadd.f32 %v194_v16, %v165_v15  ;;  %v1302_v15 = vld [vmem:[#allocation5 + $0x1c0] sm:$0xf]  ;;  %v1559_v16 = vld [vmem:[#allocation5 + $0x1c4] sm:$0xf0] }
  0x97   :  { %v200_v21 = vsel %vm198_vm1, %v195_v17, 0.0 }
  0x99   :  { %v181_v19 = vpop.f32.mrf.mxu2 }
  0x9a   :  { %v182_v20 = vadd.f32 %v181_v19, %v164_v18  ;;  %v1303_v19 = vor.u32 %v1559_v16, %v1302_v15 }
  0x9c   :  { %v196_v22 = vpop.f32.mrf.mxu1  ;;  %v199_v23 = vsel %vm198_vm1, %v182_v20, 0.0  ;;  %437 = vmatpush.bf16.msra.mxu3 %v1303_v19  ;;  %v1568_v19 = vld [vmem:[#allocation5 + $0x254] sm:$0xf0] }
  0x9d   :  { %v201_v24 = vadd.f32 %v200_v21, %v199_v23  ;;  %v1550_v21 = vld [vmem:[#allocation5 + $0x134] sm:$0xf0]  ;;  %v1298_v23 = vld [vmem:[#allocation5 + $0x1b0] sm:$0xf] }
  0x9f   :  { %202 = vadd.xlane.f32.xlu0 %v201_v24  ;;  %v1558_v24 = vld [vmem:[#allocation5 + $0x1b4] sm:$0xf0] }
  0xa0   :  { %v1299_v27 = vor.u32 %v1558_v24, %v1298_v23 }
  0xa1   :  { %v183_v25 = vpop.f32.mrf.mxu2 }
  0xa2   :  { %438 = vmatpush.bf16.msra.mxu3 %v1299_v27 }
 0x112   :  { %v203_v34 = vpop.xlane.xlu0 %202 }
 0x113   :  { %v211_v35 = vmul.f32 %v1796_v33, %v203_v34  ;;  %v1557_v34 = vld [vmem:[#allocation5 + $0x1a4] sm:$0xf0] }
 0x115   :  { %v1799_v36 = vsub.f32 %v182_v20, %v211_v35  ;;  %v1801_v37 = vsub.f32 %v195_v17, %v211_v35  ;;  %v1271_v17 = vor.u32 %v1551_v14, %v1270_v13  ;;  %v1266_v20 = vld [vmem:[#allocation5 + $0x130] sm:$0xf] }
 0x116   :  { %v1267_v26 = vor.u32 %v1550_v21, %v1266_v20  ;;  %v1337_v20 = vld [vmem:[#allocation5 + $0x240] sm:$0xf]  ;;  %v113_v21 = vmul.f32 %v1783_v11, %v1783_v11 }
 0x117   :  { %v214_v38 = vmul.f32 %v1799_v36, %v1799_v36  ;;  %v215_v39 = vmul.f32 %v1801_v37, %v1801_v37  ;;  %424 = vmatpush.bf16.msrb.mxu2 %v1271_v17 }
 0x119   :  { %v216_v40 = vsel %vm198_vm1, %v214_v38, 0.0  ;;  %v217_v41 = vsel %vm198_vm1, %v215_v39, 0.0  ;;  %v1263_v38 = vor.u32 %v1549_v29, %v1262_v28  ;;  %v76_v39 = vrot.slane %v75_v30, 4 }
 0x11a   :  { %v218_v42 = vadd.f32 %v217_v41, %v216_v40  ;;  %v1234_v40 = vld [vmem:[%s1941_s3 + $0x1] ss:$8 sm:$0x3]  ;;  %v1295_v41 = vor.u32 %v1557_v34, %v1294_v32  ;;  %v1742_v32 = vmov 32.0   ;;  %v1333_v34 = vld [vmem:[#allocation5 + $0x230] sm:$0xf] }
 0x11b   :  { %425 = vmatpush.bf16.msrb.mxu2 %v1267_v26  ;;  %v236_v44 = vperm.slane %v1234_v40, 0  ;;  %v237_v45 = vperm.slane %v1234_v40, 1  ;;  %v77_v47 = vadd.f32 %v76_v39, %v75_v30  ;;  %v114_v30 = vsel %vm72_vm2, %v113_v21, 0.0  ;;  %v1329_v40 = vld [vmem:[#allocation5 + $0x220] sm:$0xf] }
 0x11c   :  { %219 = vadd.xlane.f32.xlu0 %v218_v42  ;;  %439 = vmatpush.bf16.msra.mxu3 %v1295_v41  ;;  %v517_v41 = vstv %s1818_s5 }
 0x11d   :  { %v78_v54 = vrot.slane %v77_v47, 2  ;;  %115 = vadd.xlane.f32.xlu2 %v114_v30 }
 0x11f   :  { %426 = vmatpush.bf16.msrb.mxu2 %v1263_v38  ;;  %v79_v59 = vadd.f32 %v78_v54, %v77_v47 }
 0x121   :  { %v80_v60 = vrot.slane %v79_v59, 1 }
 0x123   :  { %v81_v61 = vadd.f32 %v80_v60, %v79_v59 }
 0x125   :  { %1617 = vpush %v81_v61 }
 0x156   :  { %s1618_s10 = spop %1617 }
 0x18f   :  { %v220_v63 = vpop.xlane.xlu0 %219 }
 0x190   :  { %v221_v2 = vmul.f32 %v220_v63, %v1796_v33 }
 0x192   :  { %v222_v4 = vadd.f32 1e-05, %v221_v2 }
 0x194   :  { %1643 = vrsqrt.f32 %v222_v4  ;;  %vm229_vm5 = vweird.f32 %v222_v4 }
 0x19a   :  { %v1644_v18 = vpop.eup %1643 }
 0x19b   :  { %v224_v22 = vmul.f32 %v1644_v18, %v222_v4  ;;  %vm230_vm4 = vweird.f32 %v1644_v18 }
 0x19c   :  { %vm231_vm6 = vmor %vm229_vm5, %vm230_vm4 }
 0x19d   :  { %v225_v25 = vmul.f32 %v1644_v18, %v224_v22 }
 0x19f   :  { %v226_v31 = vmul.f32 0.5, %v225_v25  ;;  %v1567_v25 = vld [vmem:[#allocation5 + $0x244] sm:$0xf0] }
 0x1a0   :  { %v1338_v29 = vor.u32 %v1567_v25, %v1337_v20 }
 0x1a1   :  { %v227_v35 = vsub.f32 1.5, %v226_v31 }
 0x1a3   :  { %v228_v42 = vmul.f32 %v1644_v18, %v227_v35  ;;  %v1566_v35 = vld [vmem:[#allocation5 + $0x234] sm:$0xf0] }
 0x1a4   :  { %v1334_v39 = vor.u32 %v1566_v35, %v1333_v34 }
 0x1a5   :  { %v232_v46 = vsel %vm231_vm6, %v1644_v18, %v228_v42  ;;  %v1341_v18 = vld [vmem:[#allocation5 + $0x250] sm:$0xf]  ;;  %v1565_v42 = vld [vmem:[#allocation5 + $0x224] sm:$0xf0] }
 0x1a6   :  { %v233_v48 = vmul.f32 %v232_v46, %v1799_v36  ;;  %v234_v50 = vmul.f32 %v232_v46, %v1801_v37  ;;  %v1342_v24 = vor.u32 %v1568_v19, %v1341_v18  ;;  %v1330_v47 = vor.u32 %v1565_v42, %v1329_v40 }
 0x1a7   :  { %v1743_v19 = vmov 1000.0  }
 0x1a8   :  { %v240_v52 = vmul.f32 %v236_v44, %v233_v48  ;;  %v241_v53 = vmul.f32 %v237_v45, %v234_v50  ;;  %581 = vmatpush.bf16.msra.mxu0 %v1342_v24  ;;  %v68_v44 = vld [vmem:[%s1941_s3 + $0x11] ss:$0 sm:$0xff] }
 0x1a9   :  { %v518_v45 = vmul.f32 %v517_v41, %v68_v44 }
 0x1aa   :  { %v247_v55 = vadd.f32 %v243_v49, %v240_v52  ;;  %v248_v56 = vadd.f32 %v244_v51, %v241_v53 }
 0x1ab   :  { %v519_v48 = vadd.f32 %v518_v45, %v66_v43 }
 0x1ac   :  { %v1258_v57 = vmul.f32 -1.442695, %v247_v55  ;;  %v1259_v58 = vmul.f32 -1.442695, %v248_v56  ;;  %582 = vmatpush.bf16.msra.mxu0 %v1338_v29 }
 0x1ad   :  { %v1326_v50 = vmul.f32 -1.442695, %v519_v48 }
 0x1ae   :  { %1645 = vpow2.f32 %v1258_v57 }
 0x1af   :  { %1647 = vpow2.f32 %v1259_v58  ;;  %v83_v58 = vstv %s1618_s10 }
 0x1b0   :  { %583 = vmatpush.bf16.msra.mxu0 %v1334_v39 }
 0x1b4   :  { %v1646_v62 = vpop.eup %1645  ;;  %584 = vmatpush.bf16.msra.mxu0 %v1330_v47 }
 0x1b5   :  { %v1648_v36 = vpop.eup %1647  ;;  %v255_v63 = vadd.f32 1.0, %v1646_v62 }
 0x1b6   :  { %v256_v0 = vadd.f32 1.0, %v1648_v36 }
 0x1b7   :  { %1649 = vrcp.f32 %v255_v63  ;;  %v266_v5 = vand.u32 2147483647, %v255_v63  ;;  %v268_v6 = vand.u32 2147483648, %v255_v63  ;;  %vm262_vm9 = vweird.f32 %v255_v63 }
 0x1b8   :  { %1651 = vrcp.f32 %v256_v0  ;;  %v281_v8 = vand.u32 2147483647, %v256_v0  ;;  %v283_v9 = vand.u32 2147483648, %v256_v0  ;;  %vm277_vm12 = vweird.f32 %v256_v0 }
 0x1b9   :  { %vm267_vm11 = vcmp.eq.f32.partialorder %v266_v5, 8.507059e+37  ;;  %v269_v14 = vor.u32 1.1754944e-38, %v268_v6  ;;  %1653 = vrcp.f32 %v1742_v32 }
 0x1ba   :  { %vm282_vm14 = vcmp.eq.f32.partialorder %v281_v8, 8.507059e+37  ;;  %v284_v16 = vor.u32 1.1754944e-38, %v283_v9  ;;  %1655 = vpow2.f32 %v1326_v50  ;;  %v64_v8 = vld [vmem:[%s1941_s3 + $0x7] ss:$0 sm:$0xff] }
 0x1bd   :  { %v1650_v37 = vpop.eup %1649 }
 0x1be   :  { %v1652_v1 = vpop.eup %1651  ;;  %v258_v2 = vmul.f32 %v1650_v37, %v255_v63  ;;  %vm263_vm7 = vweird.f32 %v1650_v37 }
 0x1bf   :  { %v273_v3 = vmul.f32 %v1652_v1, %v256_v0  ;;  %vm278_vm8 = vweird.f32 %v1652_v1  ;;  %vm264_vm10 = vmor %vm262_vm9, %vm263_vm7  ;;  %v1654_v46 = vpop.eup %1653  ;;  %vm573_vm7 = vcmask 523264  }
 0x1c0   :  { %v259_v4 = vsub.f32 1.0, %v258_v2  ;;  %vm279_vm13 = vmor %vm277_vm12, %vm278_vm8  ;;  %v85_v49 = vmul.f32 32.0, %v1654_v46  ;;  %v1656_v52 = vpop.eup %1655  ;;  %vm89_vm15 = vweird.f32 %v1654_v46  ;;  %vm1221_vm12 = vcmask 254976  }
 0x1c1   :  { %v274_v7 = vsub.f32 1.0, %v273_v3  ;;  %v523_v54 = vadd.f32 1.0, %v1656_v52  ;;  %v67_v52 = vld [vmem:[%s1941_s3 + $0x18] ss:$0 sm:$0xff] }
 0x1c2   :  { %v260_v10 = vmul.f32 %v1650_v37, %v259_v4  ;;  %v86_v51 = vsub.f32 1.0, %v85_v49 }
 0x1c3   :  { %v275_v12 = vmul.f32 %v1652_v1, %v274_v7  ;;  %1657 = vrcp.f32 %v523_v54  ;;  %v535_v61 = vand.u32 2147483648, %v523_v54  ;;  %vm529_vm3 = vweird.f32 %v523_v54 }
 0x1c4   :  { %v261_v13 = vadd.f32 %v1650_v37, %v260_v10  ;;  %v87_v53 = vmul.f32 %v1654_v46, %v86_v51  ;;  %v533_v36 = vand.u32 2147483647, %v523_v54 }
 0x1c5   :  { %v276_v15 = vadd.f32 %v1652_v1, %v275_v12 }
 0x1c6   :  { %v265_v17 = vsel %vm264_vm10, %v1650_v37, %v261_v13  ;;  %vm534_vm6 = vcmp.eq.f32.partialorder %v533_v36, 8.507059e+37  ;;  %v1600_v36 = vld [vmem:[#allocation5 + $0x114] sm:$0xf0] }
 0x1c7   :  { %v270_v22 = vsel %vm267_vm11, %v269_v14, %v265_v17  ;;  %v280_v23 = vsel %vm279_vm13, %v1652_v1, %v276_v15  ;;  %v536_v1 = vor.u32 1.1754944e-38, %v535_v61  ;;  %v116_v15 = vpop.xlane.xlu2 %115 }
 0x1c8   :  { %v287_v26 = vmul.f32 %v270_v22, %v247_v55  ;;  %v285_v27 = vsel %vm282_vm14, %v284_v16, %v280_v23  ;;  %v88_v55 = vadd.f32 %v1654_v46, %v87_v53  ;;  %v117_v16 = vrot.slane %v116_v15, 4 }
 0x1c9   :  { %v288_v28 = vmul.f32 %v285_v27, %v248_v56  ;;  %v1658_v57 = vpop.eup %1657 }
 0x1ca   :  { %v289_v31 = vpack.c.bf16 %v287_v26, %v287_v26  ;;  %v90_v56 = vsel %vm89_vm15, %v1654_v46, %v88_v55  ;;  %v525_v59 = vmul.f32 %v1658_v57, %v523_v54  ;;  %vm530_vm4 = vweird.f32 %v1658_v57  ;;  %v69_v54 = vld [vmem:[%s1941_s3 + $0x19] ss:$0 sm:$0xff] }
 0x1cb   :  { %v290_v38 = vpack.c.bf16 %v288_v28, %v288_v28  ;;  %v91_v60 = vmul.f32 %v90_v56, %v83_v58  ;;  %vm531_vm5 = vmor %vm529_vm3, %vm530_vm4  ;;  %v118_v20 = vadd.f32 %v117_v16, %v116_v15  ;;  %v1394_v15 = vld [vmem:[#allocation5 + $0x80] sm:$0xf]  ;;  %v1582_v16 = vld [vmem:[#allocation5 + $0x84] sm:$0xf0] }
 0x1cc   :  { %427 = vmatmul.bf16.vlgmr.msrb.gmra.mxu2 %v289_v31  ;;  %v526_v62 = vsub.f32 1.0, %v525_v59 }
 0x1cd   :  { %440 = vmatmul.bf16.vlgmr.msra.gmra.mxu3 %v290_v38  ;;  %v92_v63 = vsub.f32 %v1783_v11, %v91_v60  ;;  %v119_v23 = vrot.slane %v118_v20, 2 }
 0x1ce   :  { %v527_v0 = vmul.f32 %v1658_v57, %v526_v62  ;;  %v1466_v62 = vld [vmem:[#allocation5 + $0x110] sm:$0xf] }
 0x1cf   :  { %v93_v37 = vmul.f32 %v92_v63, %v92_v63  ;;  %v120_v28 = vadd.f32 %v119_v23, %v118_v20  ;;  %v1599_v63 = vld [vmem:[#allocation5 + $0x114] sm:$0xf] }
 0x1d0   :  { %v528_v2 = vadd.f32 %v1658_v57, %v527_v0  ;;  %v1467_v0 = vor.u32 %v1600_v36, %v1466_v62  ;;  %v1595_v23 = vld [vmem:[#allocation5 + $0xf4] sm:$0xf]  ;;  %v1590_v62 = vld [vmem:[#allocation5 + $0xc4] sm:$0xf0]  ;;  %v1589_v36 = vld [vmem:[#allocation5 + $0xc4] sm:$0xf] }
 0x1d1   :  { %v94_v3 = vsel %vm72_vm2, %v93_v37, 0.0  ;;  %v121_v38 = vrot.slane %v120_v28, 1  ;;  %v1468_v37 = vld [vmem:[#allocation5 + $0x118] sm:$0xf0] }
 0x1d2   :  { %95 = vadd.xlane.f32.xlu1 %v94_v3  ;;  %v532_v4 = vsel %vm531_vm5, %v1658_v57, %v528_v2  ;;  %v1584_v2 = vld [vmem:[#allocation5 + $0x94] sm:$0xf0]  ;;  %v1471_v3 = vor.u32 %v1599_v63, %v1468_v37  ;;  %820 = vmatpush.bf16.msrb.mxu0 %v1467_v0  ;;  %v1428_v0 = vld [vmem:[#allocation5 + $0xc8] sm:$0xf0]  ;;  %v1362_v37 = vld [vmem:[#allocation5 + $0x40] sm:$0xf] }
 0x1d3   :  { %v537_v5 = vsel %vm534_vm6, %v536_v1, %v532_v4  ;;  %v122_v46 = vadd.f32 %v121_v38, %v120_v28  ;;  %v1402_v1 = vld [vmem:[#allocation5 + $0x90] sm:$0xf]  ;;  %v1580_v28 = vld [vmem:[#allocation5 + $0x74] sm:$0xf0] }
 0x1d4   :  { %v539_v6 = vmul.f32 %v537_v5, %v519_v48  ;;  %v1403_v4 = vor.u32 %v1584_v2, %v1402_v1  ;;  %v1583_v5 = vld [vmem:[#allocation5 + $0x94] sm:$0xf]  ;;  %846 = vmatpush.bf16.msrb.mxu3 %v1471_v3  ;;  %v1574_v1 = vld [vmem:[#allocation5 + $0x44] sm:$0xf0]  ;;  %v1431_v2 = vor.u32 %v1589_v36, %v1428_v0 }
 0x1d5   :  { %v1363_v3 = vor.u32 %v1574_v1, %v1362_v37 }
 0x1d6   :  { %v540_v7 = vpack.c.bf16 %v539_v6, %v539_v6  ;;  %v1404_v6 = vld [vmem:[#allocation5 + $0x98] sm:$0xf0]  ;;  %807 = vmatpush.bf16.msrb.mxu1 %v1403_v4  ;;  %v1573_v4 = vld [vmem:[#allocation5 + $0x44] sm:$0xf] }
 0x1d8   :  { %1343 = vmatmul.msk.bf16.vlgmr.msra.gmra.mxu0 %vm573_vm7, %v540_v7  ;;  %v1458_v7 = vld [vmem:[#allocation5 + $0x100] sm:$0xf]  ;;  %vm1224_vm7 = vcmask 0  }
 0x245   :  { %v96_v25 = vpop.xlane.xlu1 %95 }
 0x246   :  { %v97_v27 = vrot.slane %v96_v25, 4 }
 0x248   :  { %v98_v30 = vadd.f32 %v97_v27, %v96_v25  ;;  %v1386_v27 = vld [vmem:[#allocation5 + $0x70] sm:$0xf] }
 0x24a   :  { %v99_v34 = vrot.slane %v98_v30, 2 }
 0x24c   :  { %v100_v39 = vadd.f32 %v99_v34, %v98_v30  ;;  %v1579_v30 = vld [vmem:[#allocation5 + $0x74] sm:$0xf]  ;;  %v1442_v34 = vld [vmem:[#allocation5 + $0xe0] sm:$0xf] }
 0x24e   :  { %v101_v43 = vrot.slane %v100_v39, 1 }
 0x24f   :  { %v428_v9 = vpop.f32.mrf.mxu2 }
 0x250   :  { %v429_v10 = vadd.f32 %v428_v9, %v64_v8  ;;  %v441_v12 = vpop.f32.mrf.mxu3  ;;  %v102_v47 = vadd.f32 %v101_v43, %v100_v39  ;;  %v1407_v8 = vor.u32 %v1583_v5, %v1404_v6  ;;  %v1598_v9 = vld [vmem:[#allocation5 + $0x104] sm:$0xf0]  ;;  %v1593_v39 = vld [vmem:[#allocation5 + $0xe4] sm:$0xf]  ;;  %v1364_v5 = vld [vmem:[#allocation5 + $0x48] sm:$0xf0] }
 0x251   :  { %v1578_v43 = vld [vmem:[#allocation5 + $0x64] sm:$0xf0]  ;;  %v1367_v6 = vor.u32 %v1573_v4, %v1364_v5 }
 0x252   :  { %v442_v13 = vadd.f32 %v441_v12, %v429_v10  ;;  %1619 = vpush %v102_v47  ;;  %v1597_v10 = vld [vmem:[#allocation5 + $0x104] sm:$0xf]  ;;  %v1460_v12 = vld [vmem:[#allocation5 + $0x108] sm:$0xf0]  ;;  %833 = vmatpush.bf16.msra.mxu2 %v1407_v8  ;;  %v1588_v8 = vld [vmem:[#allocation5 + $0xb4] sm:$0xf0] }
 0x253   :  { %1621 = vpush %v122_v46 }
 0x254   :  { %v1324_v14 = vmul.f32 -1.442695, %v442_v13 }
 0x255   :  { %v586_v56 = vpop.f32.mrf.mxu0 }
 0x256   :  { %1659 = vpow2.f32 %v1324_v14  ;;  %v587_v57 = vadd.f32 %v586_v56, %v67_v52  ;;  %v1463_v14 = vor.u32 %v1597_v10, %v1460_v12  ;;  %v1436_v52 = vld [vmem:[#allocation5 + $0xd8] sm:$0xf0]  ;;  %v1575_v56 = vld [vmem:[#allocation5 + $0x54] sm:$0xf] }
 0x257   :  { %v430_v17 = vpop.f32.mrf.mxu2  ;;  %1661 = vrcp.f32 %v1743_v19  ;;  %v1396_v19 = vld [vmem:[#allocation5 + $0x88] sm:$0xf0]  ;;  %v1420_v12 = vld [vmem:[#allocation5 + $0xb8] sm:$0xf0] }
 0x258   :  { %v443_v18 = vpop.f32.mrf.mxu3  ;;  %v592_v59 = vperm.slane %v587_v57, 0  ;;  %1223 = vst [vmem:[%s1942_s4 + $0x6] sm:$0x1] %v587_v57  ;;  %v1581_v17 = vld [vmem:[#allocation5 + $0x84] sm:$0xf]  ;;  %847 = vmatpush.bf16.msrb.mxu3 %v1463_v14 }
 0x259   :  { %v1395_v18 = vor.u32 %v1582_v16, %v1394_v15  ;;  %v1399_v20 = vor.u32 %v1581_v17, %v1396_v19  ;;  %v1572_v14 = vld [vmem:[#allocation5 + $0x34] sm:$0xf0]  ;;  %v1571_v17 = vld [vmem:[#allocation5 + $0x34] sm:$0xf] }
 0x25a   :  { %594 = vrot.lane.b32.xlu2 %v592_v59, %s1744_s19 }
 0x25b   :  { %808 = vmatpush.bf16.msrb.mxu1 %v1395_v18  ;;  %834 = vmatpush.bf16.msra.mxu2 %v1399_v20  ;;  %v1356_v18 = vld [vmem:[#allocation5 + $0x38] sm:$0xf0] }
 0x25c   :  { %v1660_v21 = vpop.eup %1659  ;;  %v1359_v19 = vor.u32 %v1571_v17, %v1356_v18 }
 0x25d   :  { %v448_v22 = vadd.f32 1.0, %v1660_v21  ;;  %v1662_v24 = vpop.eup %1661  ;;  %v588_v61 = vpop.f32.mrf.mxu0  ;;  %v1450_v21 = vld [vmem:[#allocation5 + $0xf0] sm:$0xf] }
 0x25e   :  { %v503_v26 = vmul.f32 1000.0, %v1662_v24  ;;  %vm507_vm2 = vweird.f32 %v1662_v24  ;;  %v1426_v61 = vld [vmem:[#allocation5 + $0xc0] sm:$0xf] }
 0x25f   :  { %1663 = vrcp.f32 %v448_v22  ;;  %v460_v42 = vand.u32 2147483648, %v448_v22  ;;  %v458_v45 = vand.u32 2147483647, %v448_v22  ;;  %vm454_vm9 = vweird.f32 %v448_v22 }
 0x260   :  { %v504_v29 = vsub.f32 1.0, %v503_v26  ;;  %v1427_v63 = vor.u32 %v1590_v62, %v1426_v61 }
 0x261   :  { %v461_v50 = vor.u32 1.1754944e-38, %v460_v42  ;;  %vm459_vm11 = vcmp.eq.f32.partialorder %v458_v45, 8.507059e+37  ;;  %v1380_v45 = vld [vmem:[#allocation5 + $0x68] sm:$0xf0] }
 0x262   :  { %v505_v31 = vmul.f32 %v1662_v24, %v504_v29  ;;  %v1387_v29 = vor.u32 %v1580_v28, %v1386_v27  ;;  %v1346_v27 = vld [vmem:[#allocation5 + $0x20] sm:$0xf] }
 0x264   :  { %v506_v41 = vadd.f32 %v1662_v24, %v505_v31  ;;  %v1388_v31 = vld [vmem:[#allocation5 + $0x78] sm:$0xf0]  ;;  %809 = vmatpush.bf16.msrb.mxu1 %v1387_v29  ;;  %v1570_v29 = vld [vmem:[#allocation5 + $0x24] sm:$0xf0] }
 0x265   :  { %v1664_v32 = vpop.eup %1663 }
 0x266   :  { %v450_v35 = vmul.f32 %v1664_v32, %v448_v22  ;;  %vm455_vm8 = vweird.f32 %v1664_v32  ;;  %v508_v49 = vsel %vm507_vm2, %v1662_v24, %v506_v41  ;;  %v1596_v22 = vld [vmem:[#allocation5 + $0xf4] sm:$0xf0]  ;;  %v1452_v24 = vld [vmem:[#allocation5 + $0xf8] sm:$0xf0]  ;;  %v1378_v41 = vld [vmem:[#allocation5 + $0x60] sm:$0xf] }
 0x267   :  { %vm456_vm10 = vmor %vm454_vm9, %vm455_vm8  ;;  %1623 = vpush %v508_v49  ;;  %v1451_v25 = vor.u32 %v1596_v22, %v1450_v21  ;;  %v1455_v26 = vor.u32 %v1595_v23, %v1452_v24  ;;  %v1379_v46 = vor.u32 %v1578_v43, %v1378_v41  ;;  %v1592_v49 = vld [vmem:[#allocation5 + $0xd4] sm:$0xf0]  ;;  %v1410_v21 = vld [vmem:[#allocation5 + $0xa0] sm:$0xf]  ;;  %vm866_vm8 = vcmask 1041408  }
 0x268   :  { %v451_v40 = vsub.f32 1.0, %v450_v35  ;;  %v1594_v35 = vld [vmem:[#allocation5 + $0xe4] sm:$0xf0]  ;;  %v1585_v23 = vld [vmem:[#allocation5 + $0xa4] sm:$0xf] }
 0x269   :  { %848 = vmatpush.bf16.msrb.mxu3 %v1455_v26  ;;  %v1443_v38 = vor.u32 %v1594_v35, %v1442_v34  ;;  %810 = vmatpush.bf16.msrb.mxu1 %v1379_v46  ;;  %v1586_v22 = vld [vmem:[#allocation5 + $0xa4] sm:$0xf0]  ;;  %v590_v26 = vperm.slane %v1783_v11, 2 }
 0x26a   :  { %v452_v44 = vmul.f32 %v1664_v32, %v451_v40  ;;  %v1444_v40 = vld [vmem:[#allocation5 + $0xe8] sm:$0xf0]  ;;  %v1411_v24 = vor.u32 %v1586_v22, %v1410_v21 }
 0x26b   :  { %v1447_v42 = vor.u32 %v1593_v39, %v1444_v40  ;;  %v591_v34 = vadd.f32 %v590_v26, %v1783_v11  ;;  %v1746_v11 = vmov 10.0  }
 0x26c   :  { %v453_v48 = vadd.f32 %v1664_v32, %v452_v44  ;;  %v1577_v44 = vld [vmem:[#allocation5 + $0x64] sm:$0xf] }
 0x26d   :  { %v1383_v47 = vor.u32 %v1577_v44, %v1380_v45  ;;  %849 = vmatpush.bf16.msrb.mxu3 %v1447_v42  ;;  %v1745_v44 = vmov 31.0   ;;  %1222 = vst.msk [vmem:[%s1942_s4 + $0x4] sm:$0x3] %vm1221_vm12, %v591_v34 }
 0x26e   :  { %v457_v51 = vsel %vm456_vm10, %v1664_v32, %v453_v48  ;;  %v1391_v32 = vor.u32 %v1579_v30, %v1388_v31  ;;  %v1434_v48 = vld [vmem:[#allocation5 + $0xd0] sm:$0xf]  ;;  %v1569_v30 = vld [vmem:[#allocation5 + $0x24] sm:$0xf]  ;;  %v1348_v31 = vld [vmem:[#allocation5 + $0x28] sm:$0xf0] }
 0x26f   :  { %v462_v53 = vsel %vm459_vm11, %v461_v50, %v457_v51  ;;  %v1591_v50 = vld [vmem:[#allocation5 + $0xd4] sm:$0xf]  ;;  %v1435_v51 = vor.u32 %v1592_v49, %v1434_v48  ;;  %v1351_v39 = vor.u32 %v1569_v30, %v1348_v31  ;;  %v1748_v30 = vmov 1.0  }
 0x270   :  { %v464_v55 = vmul.f32 %v462_v53, %v442_v13  ;;  %v1459_v13 = vor.u32 %v1598_v9, %v1458_v7  ;;  %835 = vmatpush.bf16.msra.mxu2 %v1391_v32  ;;  %v1439_v53 = vor.u32 %v1591_v50, %v1436_v52  ;;  %v1418_v7 = vld [vmem:[#allocation5 + $0xb0] sm:$0xf]  ;;  %v1587_v9 = vld [vmem:[#allocation5 + $0xb4] sm:$0xf] }
 0x271   :  { %v1419_v10 = vor.u32 %v1588_v8, %v1418_v7  ;;  %v1423_v15 = vor.u32 %v1587_v9, %v1420_v12 }
 0x272   :  { %v465_v58 = vmul.f32 %v464_v55, %v69_v54  ;;  %821 = vmatpush.bf16.msrb.mxu0 %v1459_v13  ;;  %850 = vmatpush.bf16.msrb.mxu3 %v1439_v53  ;;  %v1370_v54 = vld [vmem:[#allocation5 + $0x50] sm:$0xf]  ;;  %v1576_v55 = vld [vmem:[#allocation5 + $0x54] sm:$0xf0]  ;;  %v71_v53 = vld [vmem:[%s1941_s3 + $0x1e] ss:$0 sm:$0xff] }
 0x273   :  { %v1371_v57 = vor.u32 %v1576_v55, %v1370_v54  ;;  %v1354_v13 = vld [vmem:[#allocation5 + $0x30] sm:$0xf] }
 0x274   :  { %v466_v60 = vsel %vm198_vm1, %v465_v58, 0.0  ;;  %836 = vmatpush.bf16.msra.mxu2 %v1383_v47  ;;  %v1372_v58 = vld [vmem:[#allocation5 + $0x58] sm:$0xf0]  ;;  %v1355_v16 = vor.u32 %v1572_v14, %v1354_v13  ;;  %vm1472_vm1 = vmpackc.low %vm168_vm0, %vm168_vm0  ;;  %v1747_v47 = vmov 0  }
 0x275   :  { %467 = vadd.xlane.f32.xlu0 %v466_v60  ;;  %v1375_v60 = vor.u32 %v1575_v56, %v1372_v58  ;;  %811 = vmatpush.bf16.msrb.mxu1 %v1371_v57 }
 0x276   :  { %822 = vmatpush.bf16.msrb.mxu0 %v1451_v25  ;;  %851 = vmatpush.bf16.msrb.mxu3 %v1431_v2  ;;  %v1412_v25 = vld [vmem:[#allocation5 + $0xa8] sm:$0xf0] }
 0x277   :  { %v1415_v28 = vor.u32 %v1585_v23, %v1412_v25  ;;  %1639 = vset.pattern.permute.xlu1 %v1747_v47  ;;  %1640 = vset.pattern.permute.xlu0 %v1747_v47 }
 0x278   :  { %837 = vmatpush.bf16.msra.mxu2 %v1375_v60 }
 0x279   :  { %812 = vmatpush.bf16.msrb.mxu1 %v1363_v3 }
 0x27a   :  { %823 = vmatpush.bf16.msrb.mxu0 %v1443_v38  ;;  %852 = vmatpush.bf16.msrb.mxu3 %v1423_v15  ;;  %v1347_v38 = vor.u32 %v1570_v29, %v1346_v27 }
 0x27c   :  { %838 = vmatpush.bf16.msra.mxu2 %v1367_v6 }
 0x27d   :  { %813 = vmatpush.bf16.msrb.mxu1 %v1355_v16 }
 0x27e   :  { %824 = vmatpush.bf16.msrb.mxu0 %v1435_v51  ;;  %853 = vmatpush.bf16.msrb.mxu3 %v1415_v28 }
 0x280   :  { %839 = vmatpush.bf16.msra.mxu2 %v1359_v19 }
 0x281   :  { %814 = vmatpush.bf16.msrb.mxu1 %v1347_v38 }
 0x282   :  { %825 = vmatpush.bf16.msrb.mxu0 %v1427_v63 }
 0x283   :  { %s1845_s20 = spop %1619 }
 0x284   :  { %s1622_s21 = spop %1621  ;;  %840 = vmatpush.bf16.msra.mxu2 %v1351_v39  ;;  %v104_v4 = vstv %s1845_s20 }
 0x285   :  { %v1847_v59 = vstv %s1622_s21 }
 0x286   :  { %1665 = vrsqrt.f32 %v1847_v59  ;;  %826 = vmatpush.bf16.msrb.mxu0 %v1419_v10  ;;  %v135_v62 = vand.u32 2147483648, %v1847_v59  ;;  %vm134_vm13 = vcmp.eq.f32.partialorder %v1847_v59, 0.0 }
 0x287   :  { %1667 = vrcp.f32 %v1745_v44 }
 0x288   :  { %1669 = vrcp.f32 %v1746_v11 }
 0x28a   :  { %827 = vmatpush.bf16.msrb.mxu0 %v1411_v24 }
 0x28c   :  { %v1666_v20 = vpop.eup %1665 }
 0x28d   :  { %v126_v32 = vmul.f32 %v1666_v20, %v1847_v59  ;;  %v1668_v46 = vpop.eup %1667 }
 0x28e   :  { %v1670_v48 = vpop.eup %1669  ;;  %v106_v50 = vmul.f32 31.0, %v1668_v46  ;;  %vm110_vm14 = vweird.f32 %v1668_v46 }
 0x28f   :  { %v127_v43 = vmul.f32 %v1666_v20, %v126_v32  ;;  %v492_v51 = vmul.f32 10.0, %v1670_v48  ;;  %vm496_vm15 = vweird.f32 %v1670_v48 }
 0x290   :  { %v107_v54 = vsub.f32 1.0, %v106_v50 }
 0x291   :  { %v128_v45 = vmul.f32 0.5, %v127_v43  ;;  %v493_v55 = vsub.f32 1.0, %v492_v51  ;;  %v1239_v43 = vld [vmem:[%s1941_s3 + $0x6] ss:$8 sm:$0x3] }
 0x292   :  { %v108_v61 = vmul.f32 %v1668_v46, %v107_v54  ;;  %v639_v44 = vperm.slane %v1239_v43, 0  ;;  %v640_v11 = vperm.slane %v1239_v43, 1  ;;  %v1522_v43 = vld [vmem:[#allocation5 + $0x1c4] sm:$0xf] }
 0x293   :  { %v129_v49 = vsub.f32 1.5, %v128_v45  ;;  %v494_v36 = vmul.f32 %v1670_v48, %v493_v55 }
 0x294   :  { %v109_v0 = vadd.f32 %v1668_v46, %v108_v61 }
 0x295   :  { %v130_v52 = vmul.f32 %v1666_v20, %v129_v49  ;;  %v495_v1 = vadd.f32 %v1670_v48, %v494_v36 }
 0x296   :  { %v111_v5 = vsel %vm110_vm14, %v1668_v46, %v109_v0 }
 0x297   :  { %v131_v57 = vmul.f32 %v130_v52, %v1847_v59  ;;  %v497_v6 = vsel %vm496_vm15, %v1670_v48, %v495_v1  ;;  %v112_v8 = vmul.f32 %v111_v5, %v104_v4  ;;  %v1236_v48 = vld [vmem:[%s1941_s3 + $0x3] ss:$8 sm:$0x3] }
 0x298   :  { %s1624_s0 = spop %1623  ;;  %v861_v54 = vperm.slane %v1236_v48, 1 }
 0x299   :  { %v489_v10 = vmin.f32 %v112_v8, 1.0  ;;  %s510_s2 = smul.f32 %s1624_s0, %s1818_s5  ;;  %v1542_v8 = vld [vmem:[#allocation5 + $0x214] sm:$0xf] }
 0x29b   :  { %v490_v14 = vmul.f32 0.3, %v489_v10  ;;  %s511_s26 = smul.f32 0.2, %s510_s2  ;;  %v1616_v10 = vld [vmem:[#allocation5 + $0x218] sm:$0xf0] }
 0x29d   :  { %v512_v22 = vstv %s511_s26 }
 0x2b4   :  { %v595_v35 = vpop.permute.xlu2 %594 }
 0x2b5   :  { %v1473_v40 = vpack.c.bf16 %v595_v35, %v595_v35  ;;  %v597_v41 = vsel %vm168_vm0, %v591_v34, %v595_v35  ;;  %vm132_vm0 = vcmp.eq.f32.partialorder %v1847_v59, inf }
 0x2b6   :  { %v599_v42 = vpack.c.bf16 %v597_v41, %v597_v41  ;;  %v133_v63 = vsel %vm132_vm0, %v1847_v59, %v131_v57 }
 0x2b7   :  { %1474 = vmatmul.msk.bf16.vlgmr.msrb.gmra.mxu0 %vm1472_vm1, %v1473_v40  ;;  %1477 = vmatmul.msk.bf16.vlgmr.msrb.gmra.mxu3 %vm1472_vm1, %v1473_v40  ;;  %v136_v37 = vsel %vm134_vm13, %v135_v62, %v133_v63 }
 0x2b8   :  { %815 = vmatmul.bf16.vlgmr.msrb.gmra.mxu1 %v599_v42  ;;  %841 = vmatmul.bf16.vlgmr.msra.gmra.mxu2 %v599_v42  ;;  %v137_v3 = vmul.f32 2.0, %v136_v37 }
 0x2ba   :  { %v498_v9 = vmul.f32 %v497_v6, %v137_v3  ;;  %v1510_v6 = vld [vmem:[#allocation5 + $0x194] sm:$0xf] }
 0x2bc   :  { %v499_v12 = vmin.f32 %v498_v9, 1.0 }
 0x2be   :  { %v500_v15 = vmul.f32 0.3, %v499_v12  ;;  %v1506_v12 = vld [vmem:[#allocation5 + $0x184] sm:$0xf] }
 0x2c0   :  { %v501_v20 = vadd.f32 %v500_v15, %v490_v14  ;;  %v1538_v14 = vld [vmem:[#allocation5 + $0x204] sm:$0xf]  ;;  %v1615_v15 = vld [vmem:[#allocation5 + $0x208] sm:$0xf0] }
 0x2c2   :  { %v513_v26 = vadd.f32 %v512_v22, %v501_v20  ;;  %v1534_v20 = vld [vmem:[#allocation5 + $0x1f4] sm:$0xf] }
 0x2e8   :  { %v468_v56 = vpop.xlane.xlu0 %467 }
 0x2e9   :  { %v469_v58 = vadd.f32 %v468_v56, %v71_v53  ;;  %v860_v53 = vperm.slane %v1236_v48, 0  ;;  %v1486_v48 = vld [vmem:[#allocation5 + $0x134] sm:$0xf] }
 0x2eb   :  { %v1325_v60 = vmul.f32 -1.442695, %v469_v58 }
 0x2ed   :  { %1671 = vpow2.f32 %v1325_v60 }
 0x2f3   :  { %v1672_v2 = vpop.eup %1671 }
 0x2f4   :  { %v473_v7 = vadd.f32 1.0, %v1672_v2 }
 0x2f6   :  { %1673 = vrcp.f32 %v473_v7  ;;  %v485_v17 = vand.u32 2147483648, %v473_v7  ;;  %v483_v19 = vand.u32 2147483647, %v473_v7  ;;  %vm479_vm4 = vweird.f32 %v473_v7 }
 0x2f8   :  { %v486_v23 = vor.u32 1.1754944e-38, %v485_v17  ;;  %vm484_vm6 = vcmp.eq.f32.partialorder %v483_v19, 8.507059e+37  ;;  %v1539_v17 = vor.u32 %v1615_v15, %v1538_v14  ;;  %v1606_v19 = vld [vmem:[#allocation5 + $0x178] sm:$0xf0] }
 0x2fc   :  { %v1674_v59 = vpop.eup %1673 }
 0x2fd   :  { %v475_v13 = vmul.f32 %v1674_v59, %v473_v7  ;;  %vm480_vm3 = vweird.f32 %v1674_v59  ;;  %v1608_v7 = vld [vmem:[#allocation5 + $0x198] sm:$0xf0] }
 0x2fe   :  { %vm481_vm5 = vmor %vm479_vm4, %vm480_vm3  ;;  %v1511_v9 = vor.u32 %v1608_v7, %v1510_v6 }
 0x2ff   :  { %v476_v16 = vsub.f32 1.0, %v475_v13  ;;  %v1543_v13 = vor.u32 %v1616_v10, %v1542_v8 }
 0x300   :  { %1080 = vmatpush.bf16.msra.mxu1 %v1511_v9 }
 0x301   :  { %v477_v18 = vmul.f32 %v1674_v59, %v476_v16  ;;  %1093 = vmatpush.bf16.msra.mxu0 %v1543_v13 }
 0x303   :  { %v478_v21 = vadd.f32 %v1674_v59, %v477_v18  ;;  %v1502_v18 = vld [vmem:[#allocation5 + $0x174] sm:$0xf] }
 0x305   :  { %v482_v24 = vsel %vm481_vm5, %v1674_v59, %v478_v21  ;;  %v1607_v59 = vld [vmem:[#allocation5 + $0x188] sm:$0xf0]  ;;  %v1614_v21 = vld [vmem:[#allocation5 + $0x1f8] sm:$0xf0]  ;;  %1094 = vmatpush.bf16.msra.mxu0 %v1539_v17 }
 0x306   :  { %v487_v25 = vsel %vm484_vm6, %v486_v23, %v482_v24  ;;  %v1507_v16 = vor.u32 %v1607_v59, %v1506_v12  ;;  %v1503_v23 = vor.u32 %v1606_v19, %v1502_v18 }
 0x307   :  { %v514_v27 = vmul.f32 0.2, %v487_v25  ;;  %v1535_v25 = vor.u32 %v1614_v21, %v1534_v20 }
 0x308   :  { %1081 = vmatpush.bf16.msra.mxu1 %v1507_v16 }
 0x309   :  { %v515_v28 = vadd.f32 %v514_v27, %v513_v26  ;;  %v1498_v26 = vld [vmem:[#allocation5 + $0x164] sm:$0xf]  ;;  %v1605_v27 = vld [vmem:[#allocation5 + $0x168] sm:$0xf0]  ;;  %1095 = vmatpush.bf16.msra.mxu0 %v1535_v25 }
 0x30b   :  { %v516_v29 = vmin.f32 %v515_v28, 1.0  ;;  %v1530_v28 = vld [vmem:[#allocation5 + $0x1e4] sm:$0xf] }
 0x30c   :  { %1082 = vmatpush.bf16.msra.mxu1 %v1503_v23 }
 0x30d   :  { %635 = vperm.xlu1 %1639, %v516_v29   ;;  %1225 = vst.msk [vmem:[%s1942_s4 + $0x7] sm:$0x1] %vm1224_vm7, %v516_v29  ;;  %vm1182_vm2 = vcmp.lt.f32.partialorder %v516_v29, 0.6  ;;  %v1613_v29 = vld [vmem:[#allocation5 + $0x1e8] sm:$0xf0] }
 0x30e   :  { %v1183_v31 = vsel %vm1182_vm2, 0.5, %v1748_v30 }
 0x30f   :  { %1625 = vpush %v1183_v31  ;;  %v1499_v31 = vor.u32 %v1605_v27, %v1498_v26 }
 0x311   :  { %1083 = vmatpush.bf16.msra.mxu1 %v1499_v31 }
 0x334   :  { %v829_v32 = vpop.f32.mrf.mxu0 }
 0x335   :  { %v816_v34 = vpop.f32.mrf.mxu1 }
 0x33a   :  { %v855_v35 = vpop.f32.mrf.mxu3 }
 0x33b   :  { %v842_v38 = vpop.f32.mrf.mxu2 }
 0x33c   :  { %v831_v39 = vpop.f32.mrf.mxu0 }
 0x33d   :  { %v818_v40 = vpop.f32.mrf.mxu1  ;;  %v1612_v39 = vld [vmem:[#allocation5 + $0x1d8] sm:$0xf0] }
 0x340   :  { %s1626_s23 = spop %1625 }
 0x342   :  { %v857_v41 = vpop.f32.mrf.mxu3 }
 0x343   :  { %v844_v42 = vpop.f32.mrf.mxu2  ;;  %v1490_v41 = vld [vmem:[#allocation5 + $0x144] sm:$0xf] }
 0x344   :  { %v1603_v42 = vld [vmem:[#allocation5 + $0x148] sm:$0xf0] }
 0x37f   :  { %v636_v45 = vpop.permute.xlu1 %635 }
 0x380   :  { %v643_v46 = vmul.f32 %v639_v44, %v636_v45  ;;  %v644_v47 = vmul.f32 %v640_v11, %v636_v45  ;;  %v1611_v44 = vld [vmem:[#allocation5 + $0x1c8] sm:$0xf0] }
 0x382   :  { %v645_v49 = vperm.slane %v643_v46, 0  ;;  %v646_v50 = vperm.slane %v644_v47, 0  ;;  %v1491_v46 = vor.u32 %v1603_v42, %v1490_v41  ;;  %v1523_v47 = vor.u32 %v1611_v44, %v1522_v43  ;;  %v65_v44 = vld [vmem:[%s1941_s3 + $0xf] ss:$0 sm:$0xff] }
 0x384   :  { %v817_v51 = vadd.f32 %v816_v34, %v645_v49  ;;  %v843_v52 = vadd.f32 %v842_v38, %v646_v50  ;;  %v1494_v34 = vld [vmem:[#allocation5 + $0x154] sm:$0xf]  ;;  %v1602_v49 = vld [vmem:[#allocation5 + $0x138] sm:$0xf0] }
 0x385   :  { %v1526_v38 = vld [vmem:[#allocation5 + $0x1d4] sm:$0xf] }
 0x386   :  { %v830_v55 = vadd.f32 %v829_v32, %v817_v51  ;;  %v856_v56 = vadd.f32 %v855_v35, %v843_v52  ;;  %v1531_v32 = vor.u32 %v1613_v29, %v1530_v28  ;;  %v1604_v35 = vld [vmem:[#allocation5 + $0x158] sm:$0xf0]  ;;  %v1518_v51 = vld [vmem:[#allocation5 + $0x1b4] sm:$0xf] }
 0x387   :  { %v1495_v40 = vor.u32 %v1604_v35, %v1494_v34  ;;  %v1610_v52 = vld [vmem:[#allocation5 + $0x1b8] sm:$0xf0] }
 0x388   :  { %v864_v57 = vadd.f32 %v860_v53, %v830_v55  ;;  %v865_v58 = vadd.f32 %v861_v54, %v856_v56  ;;  %1096 = vmatpush.bf16.msra.mxu0 %v1531_v32  ;;  %v1237_v53 = vld [vmem:[%s1941_s3 + $0x4] ss:$8 sm:$0x3]  ;;  %v1487_v55 = vor.u32 %v1602_v49, %v1486_v48  ;;  %v1519_v56 = vor.u32 %v1610_v52, %v1518_v51 }
 0x389   :  { %1084 = vmatpush.bf16.msra.mxu1 %v1495_v40 }
 0x38a   :  { %v867_v60 = vsel %vm866_vm8, %v864_v57, 0.0  ;;  %v868_v61 = vsel %vm866_vm8, %v865_v58, 0.0 }
 0x38b   :  { %v869_v62 = vadd.f32 %v868_v61, %v867_v60  ;;  %v1514_v61 = vld [vmem:[#allocation5 + $0x1a4] sm:$0xf] }
 0x38d   :  { %870 = vadd.xlane.f32.xlu0 %v869_v62  ;;  %1085 = vmatpush.bf16.msra.mxu1 %v1491_v46  ;;  %v1609_v62 = vld [vmem:[#allocation5 + $0x1a8] sm:$0xf0] }
 0x391   :  { %1086 = vmatpush.bf16.msra.mxu1 %v1487_v55 }
 0x400   :  { %v871_v36 = vpop.xlane.xlu0 %870 }
 0x401   :  { %v872_v63 = vmul.f32 %v871_v36, %v1796_v33 }
 0x403   :  { %v1881_v0 = vsub.f32 %v864_v57, %v872_v63  ;;  %v1883_v37 = vsub.f32 %v865_v58, %v872_v63  ;;  %v1482_v57 = vld [vmem:[#allocation5 + $0x124] sm:$0xf]  ;;  %v1601_v58 = vld [vmem:[#allocation5 + $0x128] sm:$0xf0] }
 0x404   :  { %v1483_v63 = vor.u32 %v1601_v58, %v1482_v57 }
 0x405   :  { %v875_v1 = vmul.f32 %v1881_v0, %v1881_v0  ;;  %v876_v2 = vmul.f32 %v1883_v37, %v1883_v37 }
 0x406   :  { %1087 = vmatpush.bf16.msra.mxu1 %v1483_v63  ;;  %v1142_v63 = vld [vmem:[%s1941_s3 + $0x14] ss:$0 sm:$0xff] }
 0x407   :  { %v877_v3 = vsel %vm866_vm8, %v875_v1, 0.0  ;;  %v878_v4 = vsel %vm866_vm8, %v876_v2, 0.0  ;;  %v1238_v1 = vld [vmem:[%s1941_s3 + $0x5] ss:$8 sm:$0x3]  ;;  %v897_v2 = vperm.slane %v1237_v53, 0 }
 0x408   :  { %v879_v5 = vadd.f32 %v878_v4, %v877_v3  ;;  %v898_v3 = vperm.slane %v1237_v53, 1  ;;  %v1515_v4 = vor.u32 %v1609_v62, %v1514_v61  ;;  %v904_v8 = vperm.slane %v1238_v1, 0 }
 0x409   :  { %v905_v9 = vperm.slane %v1238_v1, 1  ;;  %v1135_v1 = vld [vmem:[%s1941_s3 + $0x13] ss:$0 sm:$0xff] }
 0x40a   :  { %880 = vadd.xlane.f32.xlu0 %v879_v5 }
 0x47d   :  { %v881_v22 = vpop.xlane.xlu0 %880 }
 0x47e   :  { %v882_v24 = vmul.f32 %v881_v22, %v1796_v33  ;;  %v1527_v33 = vor.u32 %v1612_v39, %v1526_v38 }
 0x480   :  { %v883_v30 = vadd.f32 1e-05, %v882_v24  ;;  %1097 = vmatpush.bf16.msra.mxu0 %v1527_v33 }
 0x482   :  { %1675 = vrsqrt.f32 %v883_v30  ;;  %vm890_vm10 = vweird.f32 %v883_v30 }
 0x484   :  { %1098 = vmatpush.bf16.msra.mxu0 %v1523_v47 }
 0x488   :  { %v1676_v11 = vpop.eup %1675  ;;  %1099 = vmatpush.bf16.msra.mxu0 %v1519_v56 }
 0x489   :  { %v885_v45 = vmul.f32 %v1676_v11, %v883_v30  ;;  %vm891_vm9 = vweird.f32 %v1676_v11 }
 0x48a   :  { %vm892_vm11 = vmor %vm890_vm10, %vm891_vm9 }
 0x48b   :  { %v886_v50 = vmul.f32 %v1676_v11, %v885_v45 }
 0x48c   :  { %1100 = vmatpush.bf16.msra.mxu0 %v1515_v4 }
 0x48d   :  { %v887_v54 = vmul.f32 0.5, %v886_v50 }
 0x48f   :  { %v888_v60 = vsub.f32 1.5, %v887_v54 }
 0x491   :  { %v889_v36 = vmul.f32 %v1676_v11, %v888_v60 }
 0x493   :  { %v893_v5 = vsel %vm892_vm11, %v1676_v11, %v889_v36 }
 0x494   :  { %v894_v6 = vmul.f32 %v893_v5, %v1881_v0  ;;  %v895_v7 = vmul.f32 %v893_v5, %v1883_v37 }
 0x496   :  { %v901_v10 = vmul.f32 %v897_v2, %v894_v6  ;;  %v902_v12 = vmul.f32 %v898_v3, %v895_v7  ;;  %v1128_v2 = vld [vmem:[%s1941_s3 + $0x12] ss:$0 sm:$0xff] }
 0x498   :  { %v908_v59 = vadd.f32 %v904_v8, %v901_v10  ;;  %v909_v13 = vadd.f32 %v905_v9, %v902_v12  ;;  %v1149_v10 = vld [vmem:[%s1941_s3 + $0x15] ss:$0 sm:$0xff] }
 0x49a   :  { %v1478_v14 = vmul.f32 -1.442695, %v908_v59  ;;  %v1479_v15 = vmul.f32 -1.442695, %v909_v13 }
 0x49c   :  { %1677 = vpow2.f32 %v1478_v14 }
 0x49d   :  { %1679 = vpow2.f32 %v1479_v15 }
 0x4a2   :  { %v1678_v16 = vpop.eup %1677 }
 0x4a3   :  { %v1680_v17 = vpop.eup %1679  ;;  %v916_v18 = vadd.f32 1.0, %v1678_v16 }
 0x4a4   :  { %v917_v19 = vadd.f32 1.0, %v1680_v17 }
 0x4a5   :  { %1681 = vrcp.f32 %v916_v18  ;;  %v929_v23 = vand.u32 2147483648, %v916_v18  ;;  %v927_v26 = vand.u32 2147483647, %v916_v18  ;;  %vm923_vm0 = vweird.f32 %v916_v18 }
 0x4a6   :  { %1683 = vrcp.f32 %v917_v19  ;;  %v944_v27 = vand.u32 2147483648, %v917_v19  ;;  %v942_v29 = vand.u32 2147483647, %v917_v19  ;;  %vm938_vm14 = vweird.f32 %v917_v19 }
 0x4a7   :  { %v930_v31 = vor.u32 1.1754944e-38, %v929_v23  ;;  %vm928_vm15 = vcmp.eq.f32.partialorder %v927_v26, 8.507059e+37 }
 0x4a8   :  { %v945_v35 = vor.u32 1.1754944e-38, %v944_v27  ;;  %vm943_vm4 = vcmp.eq.f32.partialorder %v942_v29, 8.507059e+37 }
 0x4ab   :  { %v1682_v0 = vpop.eup %1681 }
 0x4ac   :  { %v1684_v37 = vpop.eup %1683  ;;  %v919_v20 = vmul.f32 %v1682_v0, %v916_v18  ;;  %vm924_vm1 = vweird.f32 %v1682_v0 }
 0x4ad   :  { %v934_v21 = vmul.f32 %v1684_v37, %v917_v19  ;;  %vm939_vm12 = vweird.f32 %v1684_v37  ;;  %vm925_vm13 = vmor %vm923_vm0, %vm924_vm1 }
 0x4ae   :  { %v920_v22 = vsub.f32 1.0, %v919_v20  ;;  %vm940_vm3 = vmor %vm938_vm14, %vm939_vm12 }
 0x4af   :  { %v935_v24 = vsub.f32 1.0, %v934_v21 }
 0x4b0   :  { %v921_v25 = vmul.f32 %v1682_v0, %v920_v22 }
 0x4b1   :  { %v936_v28 = vmul.f32 %v1684_v37, %v935_v24 }
 0x4b2   :  { %v922_v30 = vadd.f32 %v1682_v0, %v921_v25 }
 0x4b3   :  { %v937_v32 = vadd.f32 %v1684_v37, %v936_v28 }
 0x4b4   :  { %v926_v34 = vsel %vm925_vm13, %v1682_v0, %v922_v30  ;;  %v70_v0 = vld [vmem:[%s1941_s3 + $0x16] ss:$0 sm:$0xff]  ;;  %s1232_s3 = sld [smem:[#allocation2 + $0x1]] }
 0x4b5   :  { %v931_v38 = vsel %vm928_vm15, %v930_v31, %v926_v34  ;;  %v941_v39 = vsel %vm940_vm3, %v1684_v37, %v937_v32 }
 0x4b6   :  { %v948_v40 = vmul.f32 %v931_v38, %v908_v59  ;;  %v946_v33 = vsel %vm943_vm4, %v945_v35, %v941_v39 }
 0x4b7   :  { %v949_v41 = vmul.f32 %v946_v33, %v909_v13  ;;  %v1126_v13 = vlaneseq }
 0x4b8   :  { %v950_v42 = vpack.c.bf16 %v948_v40, %v948_v40 }
 0x4b9   :  { %v951_v43 = vpack.c.bf16 %v949_v41, %v949_v41  ;;  %v1127_v14 = vand.u32 127, %v1126_v13 }
 0x4ba   :  { %1088 = vmatmul.bf16.vlgmr.msra.gmra.mxu1 %v950_v42  ;;  %v1184_v42 = vstv %s1232_s3 }
 0x4bb   :  { %1101 = vmatmul.bf16.vlgmr.msra.gmra.mxu0 %v951_v43  ;;  %vm1133_vm9 = vcmp.eq.s32.totalorder %v1127_v14, 0  ;;  %vm1140_vm10 = vcmp.eq.s32.totalorder %v1127_v14, 1  ;;  %vm1147_vm11 = vcmp.eq.s32.totalorder %v1127_v14, 2  ;;  %vm1154_vm1 = vcmp.eq.s32.totalorder %v1127_v14, 3 }
 0x537   :  { %v1089_v11 = vpop.f32.mrf.mxu1 }
 0x538   :  { %v1090_v45 = vadd.f32 %v1089_v11, %v65_v44  ;;  %v1102_v46 = vpop.f32.mrf.mxu0  ;;  %v1188_v11 = vstv %s1626_s23 }
 0x53a   :  { %v1103_v47 = vadd.f32 %v1102_v46, %v1090_v45  ;;  %v1192_v46 = vstv %s1233_s22 }
 0x53c   :  { %v1544_v48 = vmul.f32 -1.442695, %v1103_v47 }
 0x53e   :  { %1685 = vpow2.f32 %v1544_v48 }
 0x53f   :  { %v1091_v49 = vpop.f32.mrf.mxu1 }
 0x540   :  { %v1104_v50 = vpop.f32.mrf.mxu0 }
 0x544   :  { %v1686_v51 = vpop.eup %1685 }
 0x545   :  { %v1109_v52 = vadd.f32 1.0, %v1686_v51 }
 0x547   :  { %1687 = vrcp.f32 %v1109_v52  ;;  %v1121_v56 = vand.u32 2147483648, %v1109_v52  ;;  %v1119_v58 = vand.u32 2147483647, %v1109_v52  ;;  %vm1115_vm6 = vweird.f32 %v1109_v52 }
 0x549   :  { %v1122_v61 = vor.u32 1.1754944e-38, %v1121_v56  ;;  %vm1120_vm2 = vcmp.eq.f32.partialorder %v1119_v58, 8.507059e+37 }
 0x54d   :  { %v1688_v53 = vpop.eup %1687 }
 0x54e   :  { %v1111_v54 = vmul.f32 %v1688_v53, %v1109_v52  ;;  %vm1116_vm5 = vweird.f32 %v1688_v53 }
 0x54f   :  { %vm1117_vm7 = vmor %vm1115_vm6, %vm1116_vm5 }
 0x550   :  { %v1112_v55 = vsub.f32 1.0, %v1111_v54 }
 0x552   :  { %v1113_v57 = vmul.f32 %v1688_v53, %v1112_v55 }
 0x554   :  { %v1114_v60 = vadd.f32 %v1688_v53, %v1113_v57 }
 0x556   :  { %v1118_v62 = vsel %vm1117_vm7, %v1688_v53, %v1114_v60 }
 0x557   :  { %v1123_v36 = vsel %vm1120_vm2, %v1122_v61, %v1118_v62 }
 0x558   :  { %v1125_v3 = vmul.f32 %v1123_v36, %v1103_v47 }
 0x55a   :  { %v1143_v4 = vmul.f32 %v1142_v63, %v1125_v3  ;;  %v1136_v5 = vmul.f32 %v1135_v1, %v1125_v3  ;;  %v1129_v6 = vmul.f32 %v1128_v2, %v1125_v3  ;;  %v1150_v12 = vmul.f32 %v1149_v10, %v1125_v3 }
 0x55c   :  { %v1144_v7 = vsel %vm866_vm8, %v1143_v4, 0.0  ;;  %v1137_v8 = vsel %vm866_vm8, %v1136_v5, 0.0  ;;  %v1130_v9 = vsel %vm866_vm8, %v1129_v6, 0.0  ;;  %v1151_v59 = vsel %vm866_vm8, %v1150_v12, 0.0 }
 0x55d   :  { %1145 = vadd.xlane.f32.xlu1 %v1144_v7  ;;  %1138 = vadd.xlane.f32.xlu0 %v1137_v8  ;;  %vm1157_vm8 = vcmask 25600  }
 0x55e   :  { %1131 = vadd.xlane.f32.xlu2 %v1130_v9 }
 0x565   :  { %1152 = vadd.xlane.f32.xlu0 %v1151_v59 }
 0x5d0   :  { %v1139_v15 = vpop.xlane.xlu0 %1138  ;;  %v1146_v19 = vpop.xlane.xlu1 %1145 }
 0x5d1   :  { %v1132_v16 = vpop.xlane.xlu2 %1131 }
 0x5d2   :  { %v1134_v17 = vsel %vm1133_vm9, %v1132_v16, 0.0 }
 0x5d3   :  { %v1141_v18 = vsel %vm1140_vm10, %v1139_v15, %v1134_v17 }
 0x5d4   :  { %v1148_v20 = vsel %vm1147_vm11, %v1146_v19, %v1141_v18 }
 0x5d8   :  { %v1153_v37 = vpop.xlane.xlu0 %1152 }
 0x5d9   :  { %v1155_v21 = vsel %vm1154_vm1, %v1153_v37, %v1148_v20 }
 0x5da   :  { %v1156_v22 = vadd.f32 %v1155_v21, %v70_v0 }
 0x5dc   :  { %v1158_v23 = vsel %vm1157_vm8, %v1156_v22, -inf }
 0x5dd   :  { %1159 = vmax.xlane.f32.xlu0 %v1158_v23 }
 0x650   :  { %v1160_v24 = vpop.xlane.xlu0 %1159 }
 0x651   :  { %v1161_v25 = vsub.f32 %v1156_v22, %v1160_v24 }
 0x653   :  { %v1162_v26 = vmul.f32 1.442695, %v1161_v25 }
 0x655   :  { %1689 = vpow2.f32 %v1162_v26 }
 0x65b   :  { %v1690_v27 = vpop.eup %1689 }
 0x65c   :  { %v1164_v28 = vsel %vm1157_vm8, %v1690_v27, 0.0 }
 0x65d   :  { %1165 = vadd.xlane.f32.xlu0 %v1164_v28 }
 0x6d0   :  { %v1166_v29 = vpop.xlane.xlu0 %1165 }
 0x6d1   :  { %1691 = vrcp.f32 %v1166_v29  ;;  %v1178_v34 = vand.u32 2147483648, %v1166_v29  ;;  %v1176_v38 = vand.u32 2147483647, %v1166_v29  ;;  %vm1172_vm0 = vweird.f32 %v1166_v29 }
 0x6d3   :  { %v1179_v40 = vor.u32 1.1754944e-38, %v1178_v34  ;;  %vm1177_vm14 = vcmp.eq.f32.partialorder %v1176_v38, 8.507059e+37 }
 0x6d7   :  { %v1692_v30 = vpop.eup %1691 }
 0x6d8   :  { %v1168_v31 = vmul.f32 %v1692_v30, %v1166_v29  ;;  %vm1173_vm12 = vweird.f32 %v1692_v30 }
 0x6d9   :  { %vm1174_vm13 = vmor %vm1172_vm0, %vm1173_vm12 }
 0x6da   :  { %v1169_v32 = vsub.f32 1.0, %v1168_v31 }
 0x6dc   :  { %v1170_v35 = vmul.f32 %v1692_v30, %v1169_v32 }
 0x6de   :  { %v1171_v39 = vadd.f32 %v1692_v30, %v1170_v35 }
 0x6e0   :  { %v1175_v33 = vsel %vm1174_vm13, %v1692_v30, %v1171_v39 }
 0x6e1   :  { %v1180_v41 = vsel %vm1177_vm14, %v1179_v40, %v1175_v33 }
 0x6e2   :  { %v1181_v43 = vmul.f32 %v1690_v27, %v1180_v41 }
 0x6e4   :  { %v1185_v44 = vmul.f32 %v1184_v42, %v1181_v43 }
 0x6e6   :  { %v1190_v45 = vmul.f32 %v1188_v11, %v1185_v44 }
 0x6e8   :  { %v1191_v47 = vsel %vm1133_vm9, %v1190_v45, %v1181_v43 }
 0x6e9   :  { %v1193_v48 = vadd.f32 %v1192_v46, %v1191_v47 }
 0x6eb   :  { %v1194_v49 = vsel %vm1154_vm1, %v1193_v48, %v1191_v47 }
 0x6ec   :  { %v1195_v50 = vsel %vm1157_vm8, %v1194_v49, -inf  ;;  %1220 = vst.msk [vmem:[%s1942_s4 + $0x2] sm:$0x3] %vm1157_vm8, %v1194_v49 }
 0x6ed   :  { %1196 = vmax.xlane.f32.xlu0 %v1195_v50 }
 0x760   :  { %v1197_v51 = vpop.xlane.xlu0 %1196 }
 0x761   :  { %v1198_v52 = vsub.f32 %v1194_v49, %v1197_v51 }
 0x763   :  { %v1199_v53 = vmul.f32 1.442695, %v1198_v52 }
 0x765   :  { %1693 = vpow2.f32 %v1199_v53 }
 0x76b   :  { %v1694_v54 = vpop.eup %1693 }
 0x76c   :  { %v1201_v55 = vsel %vm1157_vm8, %v1694_v54, 0.0 }
 0x76d   :  { %1202 = vadd.xlane.f32.xlu2 %v1201_v55 }
 0x7e0   :  { %v1203_v56 = vpop.xlane.xlu2 %1202 }
 0x7e1   :  { %1695 = vrcp.f32 %v1203_v56  ;;  %v1215_v61 = vand.u32 2147483648, %v1203_v56  ;;  %v1213_v36 = vand.u32 2147483647, %v1203_v56  ;;  %vm1209_vm3 = vweird.f32 %v1203_v56 }
 0x7e3   :  { %v1216_v1 = vor.u32 1.1754944e-38, %v1215_v61  ;;  %vm1214_vm5 = vcmp.eq.f32.partialorder %v1213_v36, 8.507059e+37 }
 0x7e7   :  { %v1696_v57 = vpop.eup %1695 }
 0x7e8   :  { %v1205_v58 = vmul.f32 %v1696_v57, %v1203_v56  ;;  %vm1210_vm15 = vweird.f32 %v1696_v57 }
 0x7e9   :  { %vm1211_vm4 = vmor %vm1209_vm3, %vm1210_vm15 }
 0x7ea   :  { %v1206_v60 = vsub.f32 1.0, %v1205_v58 }
 0x7ec   :  { %v1207_v62 = vmul.f32 %v1696_v57, %v1206_v60 }
 0x7ee   :  { %v1208_v63 = vadd.f32 %v1696_v57, %v1207_v62 }
 0x7f0   :  { %v1212_v2 = vsel %vm1211_vm4, %v1696_v57, %v1208_v63 }
 0x7f1   :  { %v1217_v3 = vsel %vm1214_vm5, %v1216_v1, %v1212_v2 }
 0x7f2   :  { %v1218_v4 = vmul.f32 %v1694_v54, %v1217_v3 }
 0x7f4   :  { %1219 = vst.msk [vmem:[%s1942_s4] sm:$0x3] %vm1157_vm8, %v1218_v4 }
 0x7f5   :  { %1230 = vsyncpa [#allocation3], 1 }
 0x7f6   :  { %1231 = vsyncpa [#allocation4], 1 }

</bundles_post_ra>
